<compile_context>
chip_gen: v5e
topology: v5e:2x2
jax: 0.10.0
libtpu: 0.0.40
codegen_flags: <defaults>
</compile_context>

<pallas_src>
import functools

import numpy as np
import jax
import jax.numpy as jnp
from jax import lax
from jax.experimental import pallas as pl
from jax.experimental.pallas import tpu as pltpu


# ----------------------------------------------------------------------------
# Chip-aware VMEM budgets
# ----------------------------------------------------------------------------
def _phys_vmem_bytes():
    try:
        info = pltpu.get_tpu_info()
        v = getattr(info, "vmem_capacity_bytes", None)
        if v:
            return int(v)
    except Exception:
        pass
    return 64 * 1024 * 1024          # conservative default (v7x per-TC)


_VMEM_PHYS = _phys_vmem_bytes()
# 0.75 of physical VMEM as the scoped limit: 96 MiB on v5e/v6e, 48 MiB on v7x.
_VMEM_LIMIT = int(max(32 * 1024 * 1024, min(0.75 * _VMEM_PHYS, 112 * 1024 * 1024)))


def _round_up(x, m):
    return ((x + m - 1) // m) * m


def _round_down(x, m):
    return max((x // m) * m, m)


# ----------------------------------------------------------------------------
# 1) Row-tiled linear:  y = x @ Wt + b      (Wt pre-transposed: (Din, Dout))
# ----------------------------------------------------------------------------
def _linear_kernel(x_ref, wt_ref, b_ref, o_ref):
    x = x_ref[...]
    wt = wt_ref[...]
    acc = jnp.dot(x.astype(wt.dtype), wt, preferred_element_type=jnp.float32)
    o_ref[...] = (acc + b_ref[...]).astype(o_ref.dtype)


def _pick_row_tile(M, Din, Dout, in_bytes, out_bytes, w_bytes, sublane):
    budget = int(0.5 * _VMEM_LIMIT)
    # Resident weights + bias (counted double-buffered to be safe).
    resident = 2 * (Din * Dout * w_bytes + Dout * 4)
    # Pipelined x block + out block (double-buffered) + in-kernel cast/acc scratch.
    per_row = 2 * (Din * in_bytes + Dout * out_bytes) + Din * w_bytes + Dout * 4
    tm = max((budget - resident) // max(per_row, 1), sublane)
    tm = min(tm, 2048)
    if tm >= M:
        # Whole input fits in one step: split in two so dual-TC chips (v7x) can
        # run both halves in parallel, as long as the tiles stay a useful size.
        if M >= 4 * sublane:
            tm = _round_up(pl.cdiv(M, 2), sublane)
        else:
            tm = M
    else:
        tm = _round_down(tm, sublane)
    return min(tm, M)


def pallas_linear(x2d, wT, b, *, out_dtype=None, block_m=None):
    """x2d: (M, Din);  wT: (Din, Dout) pre-transposed;  b: (Dout,)."""
    M, Din = x2d.shape
    Dout = wT.shape[1]
    out_dtype = out_dtype or wT.dtype
    b2 = b.reshape(1, Dout).astype(jnp.float32)
    out_bytes = jnp.dtype(out_dtype).itemsize
    sublane = 16 if out_bytes < 4 else 8     # bf16 packs 16 rows per vreg group
    tm = block_m or _pick_row_tile(M, Din, Dout,
                                   jnp.dtype(x2d.dtype).itemsize,
                                   out_bytes,
                                   jnp.dtype(wT.dtype).itemsize,
                                   sublane)
    grid = (pl.cdiv(M, tm),)
    return pl.pallas_call(
        _linear_kernel,
        out_shape=jax.ShapeDtypeStruct((M, Dout), out_dtype),
        grid=grid,
        in_specs=[
            pl.BlockSpec((tm, Din), lambda i: (i, 0)),
            pl.BlockSpec((Din, Dout), lambda i: (0, 0)),   # weights resident
            pl.BlockSpec((1, Dout), lambda i: (0, 0)),     # bias resident
        ],
        out_specs=pl.BlockSpec((tm, Dout), lambda i: (i, 0)),
        compiler_params=pltpu.CompilerParams(
            dimension_semantics=("parallel",),
            vmem_limit_bytes=_VMEM_LIMIT),
    )(x2d, wT, b2)


# ----------------------------------------------------------------------------
# 2) Relative-position scores: Qv @ E^T (E resident, Tq tiled, lane-dense output)
# ----------------------------------------------------------------------------
def _rel_scores_kernel(q_ref, e_ref, s_ref):
    q = q_ref[0]                    # (H, tq, d)
    e = e_ref[...]                  # (H, Lp, d) -- same block every grid step
    s = lax.dot_general(q, e.astype(q.dtype), (((2,), (2,)), ((0,), (0,))),
                        preferred_element_type=jnp.float32)
    s_ref[0] = s.astype(s_ref.dtype)


def _pick_tq_tile(Tq, H, d, Lp, q_bytes, out_bytes, sublane):
    budget = int(0.5 * _VMEM_LIMIT)
    resident = 2 * H * Lp * d * q_bytes
    per_row = 2 * H * (d * q_bytes + Lp * out_bytes) + H * Lp * 4
    tq = max((budget - resident) // max(per_row, 1), sublane)
    if tq >= Tq:
        if Tq >= 4 * sublane:
            return _round_up(pl.cdiv(Tq, 2), sublane)   # >= 2 steps for dual-TC
        return Tq
    return min(_round_down(tq, sublane), Tq)


def pallas_rel_scores(qv, e, out_dtype):
    """qv: (B, H, Tq, d);  e: (H, Lp, d)  ->  (B, H, Tq, Lp) in out_dtype."""
    B, H, Tq, d = qv.shape
    Lp = e.shape[1]
    out_bytes = jnp.dtype(out_dtype).itemsize
    sublane = 16 if jnp.dtype(qv.dtype).itemsize < 4 else 8
    tq = _pick_tq_tile(Tq, H, d, Lp, jnp.dtype(qv.dtype).itemsize, out_bytes,
                       sublane)
    grid = (B, pl.cdiv(Tq, tq))
    return pl.pallas_call(
        _rel_scores_kernel,
        out_shape=jax.ShapeDtypeStruct((B, H, Tq, Lp), out_dtype),
        grid=grid,
        in_specs=[
            pl.BlockSpec((1, H, tq, d), lambda b, t: (b, 0, t, 0)),
            pl.BlockSpec((H, Lp, d), lambda b, t: (0, 0, 0)),   # resident
        ],
        out_specs=pl.BlockSpec((1, H, tq, Lp), lambda b, t: (b, 0, t, 0)),
        compiler_params=pltpu.CompilerParams(
            dimension_semantics=("parallel", "parallel"),
            vmem_limit_bytes=_VMEM_LIMIT),
    )(qv, e)


# ----------------------------------------------------------------------------
# 3) Fused local attention (several chunks per grid step, per-head lane slices)
# ----------------------------------------------------------------------------
def _local_attn_kernel(qu_ref, kv_ref, se_ref, *out_refs, H, d, return_attw,
                       approx_recip):
    D = H * d
    qu = qu_ref[...]                     # (bc, H, Qw, d)
    kv = kv_ref[...]                     # (bc, Kw, 2D)  fused [K | V], lane-dense
    se = se_ref[...]                     # (bc, H, Qw, Kw) compute dtype
    if return_attw:
        attw_ref, o_ref = out_refs
    else:
        (o_ref,) = out_refs

    o_heads = []
    attw_heads = []
    for h in range(H):
        quh = qu[:, h]                                 # (bc, Qw, d)
        kh = kv[:, :, h * d:(h + 1) * d]               # (bc, Kw, d)  VMEM lane slice
        vh = kv[:, :, D + h * d:D + (h + 1) * d]       # (bc, Kw, d)
        # 1/sqrt(d) and the +u bias are folded into the Q projection already.
        s = lax.dot_general(quh, kh, (((2,), (2,)), ((0,), (0,))),
                            preferred_element_type=jnp.float32)
        s = s + se[:, h].astype(jnp.float32)
        m = jnp.max(s, axis=-1, keepdims=True)
        p = jnp.exp(s - m)
        l = jnp.sum(p, axis=-1, keepdims=True)
        inv = pl.reciprocal(l, approx=approx_recip)    # EUP slot
        if return_attw:
            att = p * inv
            attw_heads.append(att[:, None])            # (bc, 1, Qw, Kw)
            pv = att
        else:
            pv = p                                     # normalize after PV matmul
        oh = lax.dot_general(pv.astype(kv.dtype), vh,
                             (((2,), (1,)), ((0,), (0,))),
                             preferred_element_type=jnp.float32)
        if not return_attw:
            oh = oh * inv                              # (Qw, d) instead of (Qw, Kw)
        o_heads.append(oh)

    # Output goes out head-interleaved on the lane axis -> (bc, Qw, D) is already
    # the layout the reference produces after its transpose(2,3).reshape(...).
    o_ref[...] = jnp.concatenate(o_heads, axis=-1).astype(o_ref.dtype)
    if return_attw:
        attw_ref[...] = jnp.concatenate(attw_heads, axis=1).astype(attw_ref.dtype)


def _pick_chunk_block(BN, H, Qw, Kw, d, act_bytes, attw_bytes):
    D = H * d
    per_io = (H * Qw * d * act_bytes        # qu
              + Kw * 2 * D * act_bytes      # fused K|V
              + H * Qw * Kw * act_bytes     # rel scores
              + Qw * D * act_bytes)         # output
    if attw_bytes:
        per_io += H * Qw * Kw * attw_bytes
    # double buffering + f32 in-kernel scratch (scores, pre-concat outputs)
    per = 2 * per_io + 4 * (H * Qw * Kw + Qw * D + Qw * Kw + Kw * d)
    budget = int(0.5 * _VMEM_LIMIT)
    bc = max(1, budget // max(per, 1))
    bc = min(bc, 1024)
    if bc >= BN:
        bc = BN if BN < 4 else pl.cdiv(BN, 2)   # keep >= 2 steps for dual-TC (v7x)
    return min(bc, BN)


def pallas_local_attention(qu5, kv, se5, *, num_heads, dim_head,
                           return_attw=False, attw_dtype=None,
                           approx_recip=True, block_chunks=None):
    """qu5: (BN,H,Qw,d);  kv: (BN,Kw,2D) fused [K|V];  se5: (BN,H,Qw,Kw)."""
    BN, H, Qw, d = qu5.shape
    Kw = kv.shape[1]
    D = H * d
    act_bytes = jnp.dtype(qu5.dtype).itemsize
    attw_dtype = attw_dtype or qu5.dtype
    bc = block_chunks or _pick_chunk_block(
        BN, H, Qw, Kw, d, act_bytes,
        jnp.dtype(attw_dtype).itemsize if return_attw else 0)
    grid = (pl.cdiv(BN, bc),)

    o_shape = jax.ShapeDtypeStruct((BN, Qw, D), qu5.dtype)
    o_spec = pl.BlockSpec((bc, Qw, D), lambda i: (i, 0, 0))
    if return_attw:
        out_shape = (jax.ShapeDtypeStruct((BN, H, Qw, Kw), attw_dtype), o_shape)
        out_specs = (pl.BlockSpec((bc, H, Qw, Kw), lambda i: (i, 0, 0, 0)), o_spec)
    else:
        out_shape, out_specs = o_shape, o_spec

    kernel = functools.partial(_local_attn_kernel, H=H, d=d,
                               return_attw=return_attw,
                               approx_recip=approx_recip)
    return pl.pallas_call(
        kernel,
        out_shape=out_shape,
        grid=grid,
        in_specs=[
            pl.BlockSpec((bc, H, Qw, d), lambda i: (i, 0, 0, 0)),
            pl.BlockSpec((bc, Kw, 2 * D), lambda i: (i, 0, 0)),
            pl.BlockSpec((bc, H, Qw, Kw), lambda i: (i, 0, 0, 0)),
        ],
        out_specs=out_specs,
        compiler_params=pltpu.CompilerParams(
            dimension_semantics=("parallel",),
            vmem_limit_bytes=_VMEM_LIMIT),
    )(qu5, kv, se5)


# ----------------------------------------------------------------------------
# Glue (mirrors the PyTorch module's data movement exactly)
# ----------------------------------------------------------------------------
def make_rel_pos_encoding(max_len, dim_model):
    pe = np.zeros((2 * max_len - 1, dim_model), np.float32)
    pos_left = np.arange(max_len - 1, 0, -1, dtype=np.float32)
    pos_right = np.arange(0, -max_len, -1, dtype=np.float32)
    pos = np.concatenate([pos_left, pos_right])[:, None]
    angles = pos / (
        10000.0 ** (2 * np.arange(0, dim_model // 2, dtype=np.float32)[None, :]
                    / dim_model))
    pe[:, 0::2] = np.sin(angles)
    pe[:, 1::2] = np.cos(angles)
    return jnp.asarray(pe)


def rel_to_abs(s, *, H, K, S, causal):
    """Strided relative->absolute indexing (mirrors the torch pads/reshapes)."""
    B = s.shape[0]
    L = s.shape[3]
    if causal:
        s = s.reshape(B, -1, H, K // S, K)
        s = jnp.pad(s, ((0, 0), (0, 0), (0, 0), (0, 0), (1, S - 1)))
        s = s.reshape(B, -1, H, K // S + 1, K)
        s = s[:, :, :, 1:]
    else:
        s = s.reshape(B, -1, H, K // S, L)
        s = jnp.pad(s, ((0, 0), (0, 0), (0, 0), (0, 0), (0, S)))
        s = s.reshape(B, -1, H, (K // S) * (2 * K - 1 + S))
        s = jnp.pad(s, ((0, 0), (0, 0), (0, 0), (0, K - 1)))
        s = s.reshape(B, -1, H, K // S + 1, L)
        s = s[:, :, :, : K // S, K - 1:]
    return s


def prepare_params(p, *, num_heads, compute_dtype):
    """One-time weight prep: fold u / 1/sqrt(d), fuse K|V, pre-transpose + cast."""
    D = p["wq"].shape[0]
    d = D // num_heads
    inv = 1.0 / (d ** 0.5)
    cd = compute_dtype
    return dict(
        wqT=(p["wq"] * inv).T.astype(cd),
        bq=((p["bq"] + p["u"]) * inv).astype(jnp.float32),
        wkvT=jnp.concatenate([p["wk"], p["wv"]], axis=0).T.astype(cd),
        bkv=jnp.concatenate([p["bk"], p["bv"]]).astype(jnp.float32),
        wpT=p["wp"].T.astype(cd),
        bp=p["bp"].astype(jnp.float32),
        woT=p["wo"].T.astype(cd),
        bo=p["bo"].astype(jnp.float32),
        pos_encoding=p["pos_encoding"],
    )


def strided_local_relpos_mhsa(x, prepped, *, num_heads, kernel_size, stride,
                              causal=False, return_attw=False):
    """Forward pass of StridedLocalRelPosMultiHeadSelfAttention (Q=K=V=x, mask=None)."""
    B, T, D = x.shape
    H, K, S = num_heads, kernel_size, stride
    d = D // H
    assert K % S == 0
    assert T % K == 0, "demo restricted to seq lengths that need no padding"
    padding = 0
    # TODO(synk): mask / padding path (torch `pad` + per-chunk mask stack) not implemented.
    compute_dtype = prepped["wqT"].dtype

    Qs = x[:, ::S]                                       # (B, Tq, D)
    Tq = Qs.shape[1]
    N = T // K
    Qw = K // S

    # Q projection with u-bias and 1/sqrt(d) folded into the pre-transposed weights.
    Q = pallas_linear(Qs.reshape(-1, D), prepped["wqT"],
                      prepped["bq"]).reshape(B, Tq, D)
    # NOTE: the reference module computes Qv = Q + v and immediately overwrites it
    # (Qv = Qu.reshape(...)), so `v` never reaches the math -- reproduced.

    # Fused K|V projection: x read from HBM once; output stays fused & lane-dense
    # in the natural (chunk, time, 2D) layout -- no XLA transpose / slice passes.
    KV = pallas_linear(x.reshape(-1, D), prepped["wkvT"],
                       prepped["bkv"]).reshape(B * N, K, 2 * D)

    # Positional-encoding projection done ONCE on (L, D); lane-pad L to mult of 128.
    pe = prepped["pos_encoding"]
    R = pe[:K] if causal else pe                         # (L, D)
    L = R.shape[0]
    E = pallas_linear(R, prepped["wpT"], prepped["bp"])  # (L, D) compute dtype
    Lp = _round_up(L, 128)
    E4 = E.reshape(L, H, d).swapaxes(0, 1)               # (H, L, d)
    if Lp != L:
        E4 = jnp.pad(E4, ((0, 0), (0, Lp - L), (0, 0)))  # zero rows -> zero scores

    # Reference module's (quirky) reshape chain for the query (its Qu == Qv).
    Qv4 = Q.reshape(B, Tq, H, d).swapaxes(1, 2)          # (B, H, Tq, d)
    Qu5 = Qv4.reshape(B, N, Qw, H, d).swapaxes(2, 3)     # (B, N, H, Qw, d)

    s_rel = pallas_rel_scores(Qv4, E4, compute_dtype)[..., :L]   # (B, H, Tq, L)
    se5 = rel_to_abs(s_rel, H=H, K=K, S=S, causal=causal)        # (B, N, H, Qw, K)

    attn_out = pallas_local_attention(
        Qu5.reshape(B * N, H, Qw, d),
        KV,
        se5.reshape(B * N, H, Qw, K),
        num_heads=H, dim_head=d,
        return_attw=return_attw,
        attw_dtype=compute_dtype,
        approx_recip=(compute_dtype != jnp.float32),
    )
    if return_attw:
        attw, O = attn_out
        attw = attw.reshape(B, N, H, Qw, K)
    else:
        attw, O = None, attn_out

    # (BN, Qw, D) is already the head-interleaved layout the reference obtains via
    # O.transpose(2,3).reshape(B,-1,D): a free reshape, no HBM transpose pass.
    O = O.reshape(B, N * Qw, D)
    O = O[:, : (S * O.shape[1] - padding - 1) // S + 1]
    O = pallas_linear(O.reshape(-1, D), prepped["woT"], prepped["bo"],
                      out_dtype=jnp.float32).reshape(B, -1, D)
    return O, attw, None


# ----------------------------------------------------------------------------
# Pure-JAX reference (direct transcription of the PyTorch forward)
# ----------------------------------------------------------------------------
def reference_forward(x, p, *, num_heads, kernel_size, stride, causal=False):
    B, T, D = x.shape
    H, K, S = num_heads, kernel_size, stride
    d = D // H
    Qs = x[:, ::S]
    Q = Qs @ p["wq"].T + p["bq"]
    Kx = x @ p["wk"].T + p["bk"]
    Vx = x @ p["wv"].T + p["bv"]
    Qu_ = Q + p["u"]
    pe = p["pos_encoding"]
    R = pe[:K] if causal else pe
    Rb = jnp.broadcast_to(R[None], (B,) + R.shape)
    E = Rb @ p["wp"].T + p["bp"]
    Qv = Qu_.reshape(B, -1, H, d).swapaxes(1, 2)
    Qu = Qv.reshape(B, -1, K // S, H, d).swapaxes(2, 3)
    Kc = Kx.reshape(B, -1, K, H, d).swapaxes(2, 3)
    Vc = Vx.reshape(B, -1, K, H, d).swapaxes(2, 3)
    E4 = E.reshape(B, -1, H, d).swapaxes(1, 2)
    sk = Qu @ jnp.swapaxes(Kc, 3, 4)
    se = rel_to_abs(Qv @ jnp.swapaxes(E4, 2, 3), H=H, K=K, S=S, causal=causal)
    scores = (sk + se) / (d ** 0.5)
    attw = jax.nn.softmax(scores, axis=-1)
    O = attw @ Vc
    O = jnp.swapaxes(O, 2, 3).reshape(B, -1, D)
    O = O @ p["wo"].T + p["bo"]
    return O, attw


# ----------------------------------------------------------------------------
# Deterministic parameter init
# ----------------------------------------------------------------------------
def init_params(key, D, H, K):
    d = D // H
    ks = jax.random.split(key, 12)
    scale = 1.0 / (D ** 0.5)

    def lin(kw, kb):
        return (
            jax.random.normal(kw, (D, D), jnp.float32) * scale,
            jax.random.normal(kb, (D,), jnp.float32) * scale,
        )

    wq, bq = lin(ks[0], ks[1])
    wk, bk = lin(ks[2], ks[3])
    wv, bv = lin(ks[4], ks[5])
    wo, bo = lin(ks[6], ks[7])
    wp, bp = lin(ks[8], ks[9])
    xav = (6.0 / (H + d)) ** 0.5
    u = jax.random.uniform(ks[10], (D,), jnp.float32, -xav, xav)
    v = jax.random.uniform(ks[11], (D,), jnp.float32, -xav, xav)
    return dict(
        wq=wq, bq=bq, wk=wk, bk=bk, wv=wv, bv=bv, wo=wo, bo=bo, wp=wp, bp=bp,
        u=u, v=v, pos_encoding=make_rel_pos_encoding(K, D),
    )


if __name__ == "__main__":
    # small shapes: B=2, T=16, dim_model=32, heads=4, kernel_size=8, stride=2
    B, T, D, H, K, S = 2, 16, 32, 4, 8, 2
    key = jax.random.PRNGKey(0)
    kx, kp = jax.random.split(key)
    x = jax.random.normal(kx, (B, T, D), jnp.float32)
    params = init_params(kp, D, H, K)

    O_ref, attw_ref = reference_forward(
        x, params, num_heads=H, kernel_size=K, stride=S, causal=False)

    # -- exact (f32 MXU, exact reciprocal) path: tight semantic check --------
    pp32 = prepare_params(params, num_heads=H, compute_dtype=jnp.float32)
    fwd32 = jax.jit(functools.partial(
        strided_local_relpos_mhsa, num_heads=H, kernel_size=K, stride=S,
        causal=False, return_attw=True))
    O32, attw32, _ = fwd32(x, pp32)
    O32, attw32 = jax.block_until_ready((O32, attw32))
    np.testing.assert_allclose(np.asarray(O32), np.asarray(O_ref),
                               rtol=1e-2, atol=1e-2)
    np.testing.assert_allclose(np.asarray(attw32), np.asarray(attw_ref),
                               rtol=1e-2, atol=1e-2)

    # -- fast (bf16 MXU, f32 softmax) path, default: no attw HBM write -------
    ppbf = prepare_params(params, num_heads=H, compute_dtype=jnp.bfloat16)
    fwdbf = jax.jit(functools.partial(
        strided_local_relpos_mhsa, num_heads=H, kernel_size=K, stride=S,
        causal=False, return_attw=False))
    O, attw, hidden = fwdbf(x, ppbf)
    O = jax.block_until_ready(O)
    np.testing.assert_allclose(np.asarray(O), np.asarray(O_ref),
                               rtol=1.5e-1, atol=1.5e-1)
    assert attw is None and hidden is None
    assert O.shape == (B, T // S, D)

    # -- fast path with (bf16) attention weights requested -------------------
    fwdbf_w = jax.jit(functools.partial(
        strided_local_relpos_mhsa, num_heads=H, kernel_size=K, stride=S,
        causal=False, return_attw=True))
    _, attw_bf, _ = fwdbf_w(x, ppbf)
    attw_bf = jax.block_until_ready(attw_bf)
    np.testing.assert_allclose(np.asarray(attw_bf.astype(jnp.float32)),
                               np.asarray(attw_ref), rtol=1.5e-1, atol=1.5e-1)
    assert attw_bf.shape == (B, T // K, H, K // S, K)

    print("KERNEL_OK")
</pallas_src>

<mosaic_0001>
module attributes {stable_mosaic.version = 11 : i64} {
  func.func @_linear_kernel(%arg0: i32, %arg1: memref<16x32xf32, #tpu.memory_space<vmem>>, %arg2: memref<32x32xf32, #tpu.memory_space<vmem>>, %arg3: memref<1x32xf32, #tpu.memory_space<vmem>>, %arg4: memref<16x32xf32, #tpu.memory_space<vmem>>) attributes {dimension_semantics = [#tpu.dimension_semantics<parallel>], iteration_bounds = array<i64: 1>, scalar_prefetch = 0 : i64, scratch_operands = 0 : i64, tpu.core_type = #tpu.core_type<tc>, window_params = [{transform_indices = @transform_0, window_bounds = array<i64: 16, 32>}, {pipeline_mode = #tpu.pipeline_mode<synchronous>, transform_indices = @transform_1, window_bounds = array<i64: 32, 32>}, {pipeline_mode = #tpu.pipeline_mode<synchronous>, transform_indices = @transform_2, window_bounds = array<i64: 1, 32>}, {transform_indices = @transform_3, window_bounds = array<i64: 16, 32>}]} {
    %c0 = arith.constant 0 : index
    %c0_0 = arith.constant 0 : index
    %0 = vector.load %arg1[%c0, %c0_0] : memref<16x32xf32, #tpu.memory_space<vmem>>, vector<16x32xf32>
    %c0_1 = arith.constant 0 : index
    %c0_2 = arith.constant 0 : index
    %1 = vector.load %arg2[%c0_1, %c0_2] : memref<32x32xf32, #tpu.memory_space<vmem>>, vector<32x32xf32>
    %cst = arith.constant dense<0.000000e+00> : vector<16x32xf32>
    %2 = tpu.matmul %0, %1, %cst {dimension_numbers = #tpu.dot_dimension_numbers<[1], [0], [0], [1], [0, 0, 1, 1], [], []>} : vector<16x32xf32>, vector<32x32xf32>, vector<16x32xf32> -> vector<16x32xf32>
    %c0_3 = arith.constant 0 : index
    %c0_4 = arith.constant 0 : index
    %3 = vector.load %arg3[%c0_3, %c0_4] : memref<1x32xf32, #tpu.memory_space<vmem>>, vector<1x32xf32>
    %4 = vector.broadcast %3 : vector<1x32xf32> to vector<16x32xf32>
    %5 = arith.addf %2, %4 : vector<16x32xf32>
    %c0_5 = arith.constant 0 : index
    %c0_6 = arith.constant 0 : index
    %6 = vector.load %arg4[%c0_5, %c0_6] : memref<16x32xf32, #tpu.memory_space<vmem>>, vector<16x32xf32>
    tpu.vector_store %arg4[%c0_5, %c0_6], %5 {strides = array<i32>} : memref<16x32xf32, #tpu.memory_space<vmem>>, vector<16x32xf32>,
    return
  }
  func.func @transform_0(%arg0: i32) -> (i32, i32) {
    %c0_i32 = arith.constant 0 : i32
    %c0_i32_0 = arith.constant 0 : i32
    return %arg0, %c0_i32 : i32, i32
  }
  func.func @transform_1(%arg0: i32) -> (i32, i32) {
    %c0_i32 = arith.constant 0 : i32
    %c0_i32_0 = arith.constant 0 : i32
    %c0_i32_1 = arith.constant 0 : i32
    return %c0_i32, %c0_i32_0 : i32, i32
  }
  func.func @transform_2(%arg0: i32) -> (i32, i32) {
    %c0_i32 = arith.constant 0 : i32
    %c0_i32_0 = arith.constant 0 : i32
    %c0_i32_1 = arith.constant 0 : i32
    return %c0_i32, %c0_i32_0 : i32, i32
  }
  func.func @transform_3(%arg0: i32) -> (i32, i32) {
    %c0_i32 = arith.constant 0 : i32
    %c0_i32_0 = arith.constant 0 : i32
    return %arg0, %c0_i32 : i32, i32
  }
}

module attributes {stable_mosaic.version = 11 : i64} {
  func.func @_linear_kernel(%arg0: i32, %arg1: memref<15x32xf32, #tpu.memory_space<vmem>>, %arg2: memref<32x32xf32, #tpu.memory_space<vmem>>, %arg3: memref<1x32xf32, #tpu.memory_space<vmem>>, %arg4: memref<15x32xf32, #tpu.memory_space<vmem>>) attributes {dimension_semantics = [#tpu.dimension_semantics<parallel>], iteration_bounds = array<i64: 1>, scalar_prefetch = 0 : i64, scratch_operands = 0 : i64, tpu.core_type = #tpu.core_type<tc>, window_params = [{transform_indices = @transform_0, window_bounds = array<i64: 15, 32>}, {pipeline_mode = #tpu.pipeline_mode<synchronous>, transform_indices = @transform_1, window_bounds = array<i64: 32, 32>}, {pipeline_mode = #tpu.pipeline_mode<synchronous>, transform_indices = @transform_2, window_bounds = array<i64: 1, 32>}, {transform_indices = @transform_3, window_bounds = array<i64: 15, 32>}]} {
    %c0 = arith.constant 0 : index
    %c0_0 = arith.constant 0 : index
    %0 = vector.load %arg1[%c0, %c0_0] : memref<15x32xf32, #tpu.memory_space<vmem>>, vector<15x32xf32>
    %c0_1 = arith.constant 0 : index
    %c0_2 = arith.constant 0 : index
    %1 = vector.load %arg2[%c0_1, %c0_2] : memref<32x32xf32, #tpu.memory_space<vmem>>, vector<32x32xf32>
    %cst = arith.constant dense<0.000000e+00> : vector<15x32xf32>
    %2 = tpu.matmul %0, %1, %cst {dimension_numbers = #tpu.dot_dimension_numbers<[1], [0], [0], [1], [0, 0, 1, 1], [], []>} : vector<15x32xf32>, vector<32x32xf32>, vector<15x32xf32> -> vector<15x32xf32>
    %c0_3 = arith.constant 0 : index
    %c0_4 = arith.constant 0 : index
    %3 = vector.load %arg3[%c0_3, %c0_4] : memref<1x32xf32, #tpu.memory_space<vmem>>, vector<1x32xf32>
    %4 = vector.broadcast %3 : vector<1x32xf32> to vector<15x32xf32>
    %5 = arith.addf %2, %4 : vector<15x32xf32>
    %c0_5 = arith.constant 0 : index
    %c0_6 = arith.constant 0 : index
    %6 = vector.load %arg4[%c0_5, %c0_6] : memref<15x32xf32, #tpu.memory_space<vmem>>, vector<15x32xf32>
    tpu.vector_store %arg4[%c0_5, %c0_6], %5 {strides = array<i32>} : memref<15x32xf32, #tpu.memory_space<vmem>>, vector<15x32xf32>,
    return
  }
  func.func @transform_0(%arg0: i32) -> (i32, i32) {
    %c0_i32 = arith.constant 0 : i32
    %c0_i32_0 = arith.constant 0 : i32
    return %arg0, %c0_i32 : i32, i32
  }
  func.func @transform_1(%arg0: i32) -> (i32, i32) {
    %c0_i32 = arith.constant 0 : i32
    %c0_i32_0 = arith.constant 0 : i32
    %c0_i32_1 = arith.constant 0 : i32
    return %c0_i32, %c0_i32_0 : i32, i32
  }
  func.func @transform_2(%arg0: i32) -> (i32, i32) {
    %c0_i32 = arith.constant 0 : i32
    %c0_i32_0 = arith.constant 0 : i32
    %c0_i32_1 = arith.constant 0 : i32
    return %c0_i32, %c0_i32_0 : i32, i32
  }
  func.func @transform_3(%arg0: i32) -> (i32, i32) {
    %c0_i32 = arith.constant 0 : i32
    %c0_i32_0 = arith.constant 0 : i32
    return %arg0, %c0_i32 : i32, i32
  }
}

module attributes {stable_mosaic.version = 11 : i64} {
  func.func @_rel_scores_kernel(%arg0: i32, %arg1: i32, %arg2: memref<1x4x8x8xf32, #tpu.memory_space<vmem>>, %arg3: memref<4x128x8xf32, #tpu.memory_space<vmem>>, %arg4: memref<1x4x8x128xf32, #tpu.memory_space<vmem>>) attributes {dimension_semantics = [#tpu.dimension_semantics<parallel>, #tpu.dimension_semantics<parallel>], iteration_bounds = array<i64: 2, 1>, scalar_prefetch = 0 : i64, scratch_operands = 0 : i64, tpu.core_type = #tpu.core_type<tc>, window_params = [{transform_indices = @transform_0, window_bounds = array<i64: 1, 4, 8, 8>}, {pipeline_mode = #tpu.pipeline_mode<synchronous>, transform_indices = @transform_1, window_bounds = array<i64: 4, 128, 8>}, {transform_indices = @transform_2, window_bounds = array<i64: 1, 4, 8, 128>}]} {
    %c0 = arith.constant 0 : index
    %c0_0 = arith.constant 0 : index
    %c0_1 = arith.constant 0 : index
    %c0_2 = arith.constant 0 : index
    %0 = vector.load %arg2[%c0, %c0_0, %c0_1, %c0_2] : memref<1x4x8x8xf32, #tpu.memory_space<vmem>>, vector<1x4x8x8xf32>
    %1 = vector.shape_cast %0 : vector<1x4x8x8xf32> to vector<4x8x8xf32>
    %c0_3 = arith.constant 0 : index
    %c0_4 = arith.constant 0 : index
    %c0_5 = arith.constant 0 : index
    %2 = vector.load %arg3[%c0_3, %c0_4, %c0_5] : memref<4x128x8xf32, #tpu.memory_space<vmem>>, vector<4x128x8xf32>
    %cst = arith.constant dense<0.000000e+00> : vector<4x8x128xf32>
    %3 = tpu.matmul %1, %2, %cst {dimension_numbers = #tpu.dot_dimension_numbers<[2], [2], [1], [1], [0, 0, 0, 1, 1, 1], [0], [0]>} : vector<4x8x8xf32>, vector<4x128x8xf32>, vector<4x8x128xf32> -> vector<4x8x128xf32>
    %c0_6 = arith.constant 0 : index
    %c0_7 = arith.constant 0 : index
    %c0_8 = arith.constant 0 : index
    %c0_9 = arith.constant 0 : index
    %4 = vector.load %arg4[%c0_6, %c0_7, %c0_8, %c0_9] : memref<1x4x8x128xf32, #tpu.memory_space<vmem>>, vector<1x4x8x128xf32>
    %5 = vector.shape_cast %4 : vector<1x4x8x128xf32> to vector<4x8x128xf32>
    %6 = vector.shape_cast %3 : vector<4x8x128xf32> to vector<1x4x8x128xf32>
    tpu.vector_store %arg4[%c0_6, %c0_7, %c0_8, %c0_9], %6 {strides = array<i32>} : memref<1x4x8x128xf32, #tpu.memory_space<vmem>>, vector<1x4x8x128xf32>,
    return
  }
  func.func @transform_0(%arg0: i32, %arg1: i32) -> (i32, i32, i32, i32) {
    %c0_i32 = arith.constant 0 : i32
    %c0_i32_0 = arith.constant 0 : i32
    %c0_i32_1 = arith.constant 0 : i32
    return %arg0, %c0_i32, %arg1, %c0_i32_0 : i32, i32, i32, i32
  }
  func.func @transform_1(%arg0: i32, %arg1: i32) -> (i32, i32, i32) {
    %c0_i32 = arith.constant 0 : i32
    %c0_i32_0 = arith.constant 0 : i32
    %c0_i32_1 = arith.constant 0 : i32
    %c0_i32_2 = arith.constant 0 : i32
    return %c0_i32, %c0_i32_0, %c0_i32_1 : i32, i32, i32
  }
  func.func @transform_2(%arg0: i32, %arg1: i32) -> (i32, i32, i32, i32) {
    %c0_i32 = arith.constant 0 : i32
    %c0_i32_0 = arith.constant 0 : i32
    %c0_i32_1 = arith.constant 0 : i32
    return %arg0, %c0_i32, %arg1, %c0_i32_0 : i32, i32, i32, i32
  }
}

module attributes {stable_mosaic.version = 11 : i64} {
  func.func @_linear_kernel(%arg0: i32, %arg1: memref<16x32xf32, #tpu.memory_space<vmem>>, %arg2: memref<32x64xf32, #tpu.memory_space<vmem>>, %arg3: memref<1x64xf32, #tpu.memory_space<vmem>>, %arg4: memref<16x64xf32, #tpu.memory_space<vmem>>) attributes {dimension_semantics = [#tpu.dimension_semantics<parallel>], iteration_bounds = array<i64: 2>, scalar_prefetch = 0 : i64, scratch_operands = 0 : i64, tpu.core_type = #tpu.core_type<tc>, window_params = [{transform_indices = @transform_0, window_bounds = array<i64: 16, 32>}, {pipeline_mode = #tpu.pipeline_mode<synchronous>, transform_indices = @transform_1, window_bounds = array<i64: 32, 64>}, {pipeline_mode = #tpu.pipeline_mode<synchronous>, transform_indices = @transform_2, window_bounds = array<i64: 1, 64>}, {transform_indices = @transform_3, window_bounds = array<i64: 16, 64>}]} {
    %c0 = arith.constant 0 : index
    %c0_0 = arith.constant 0 : index
    %0 = vector.load %arg1[%c0, %c0_0] : memref<16x32xf32, #tpu.memory_space<vmem>>, vector<16x32xf32>
    %c0_1 = arith.constant 0 : index
    %c0_2 = arith.constant 0 : index
    %1 = vector.load %arg2[%c0_1, %c0_2] : memref<32x64xf32, #tpu.memory_space<vmem>>, vector<32x64xf32>
    %cst = arith.constant dense<0.000000e+00> : vector<16x64xf32>
    %2 = tpu.matmul %0, %1, %cst {dimension_numbers = #tpu.dot_dimension_numbers<[1], [0], [0], [1], [0, 0, 1, 1], [], []>} : vector<16x32xf32>, vector<32x64xf32>, vector<16x64xf32> -> vector<16x64xf32>
    %c0_3 = arith.constant 0 : index
    %c0_4 = arith.constant 0 : index
    %3 = vector.load %arg3[%c0_3, %c0_4] : memref<1x64xf32, #tpu.memory_space<vmem>>, vector<1x64xf32>
    %4 = vector.broadcast %3 : vector<1x64xf32> to vector<16x64xf32>
    %5 = arith.addf %2, %4 : vector<16x64xf32>
    %c0_5 = arith.constant 0 : index
    %c0_6 = arith.constant 0 : index
    %6 = vector.load %arg4[%c0_5, %c0_6] : memref<16x64xf32, #tpu.memory_space<vmem>>, vector<16x64xf32>
    tpu.vector_store %arg4[%c0_5, %c0_6], %5 {strides = array<i32>} : memref<16x64xf32, #tpu.memory_space<vmem>>, vector<16x64xf32>,
    return
  }
  func.func @transform_0(%arg0: i32) -> (i32, i32) {
    %c0_i32 = arith.constant 0 : i32
    %c0_i32_0 = arith.constant 0 : i32
    return %arg0, %c0_i32 : i32, i32
  }
  func.func @transform_1(%arg0: i32) -> (i32, i32) {
    %c0_i32 = arith.constant 0 : i32
    %c0_i32_0 = arith.constant 0 : i32
    %c0_i32_1 = arith.constant 0 : i32
    return %c0_i32, %c0_i32_0 : i32, i32
  }
  func.func @transform_2(%arg0: i32) -> (i32, i32) {
    %c0_i32 = arith.constant 0 : i32
    %c0_i32_0 = arith.constant 0 : i32
    %c0_i32_1 = arith.constant 0 : i32
    return %c0_i32, %c0_i32_0 : i32, i32
  }
  func.func @transform_3(%arg0: i32) -> (i32, i32) {
    %c0_i32 = arith.constant 0 : i32
    %c0_i32_0 = arith.constant 0 : i32
    return %arg0, %c0_i32 : i32, i32
  }
}

module attributes {stable_mosaic.version = 11 : i64} {
  func.func @_local_attn_kernel(%arg0: i32, %arg1: memref<2x4x4x8xf32, #tpu.memory_space<vmem>>, %arg2: memref<2x8x64xf32, #tpu.memory_space<vmem>>, %arg3: memref<2x4x4x8xf32, #tpu.memory_space<vmem>>, %arg4: memref<2x4x4x8xf32, #tpu.memory_space<vmem>>, %arg5: memref<2x4x32xf32, #tpu.memory_space<vmem>>) attributes {dimension_semantics = [#tpu.dimension_semantics<parallel>], iteration_bounds = array<i64: 2>, scalar_prefetch = 0 : i64, scratch_operands = 0 : i64, tpu.core_type = #tpu.core_type<tc>, window_params = [{transform_indices = @transform_0, window_bounds = array<i64: 2, 4, 4, 8>}, {transform_indices = @transform_1, window_bounds = array<i64: 2, 8, 64>}, {transform_indices = @transform_2, window_bounds = array<i64: 2, 4, 4, 8>}, {transform_indices = @transform_3, window_bounds = array<i64: 2, 4, 4, 8>}, {transform_indices = @transform_4, window_bounds = array<i64: 2, 4, 32>}]} {
    %c0 = arith.constant 0 : index
    %c0_0 = arith.constant 0 : index
    %c0_1 = arith.constant 0 : index
    %c0_2 = arith.constant 0 : index
    %0 = vector.load %arg1[%c0, %c0_0, %c0_1, %c0_2] : memref<2x4x4x8xf32, #tpu.memory_space<vmem>>, vector<2x4x4x8xf32>
    %c0_3 = arith.constant 0 : index
    %c0_4 = arith.constant 0 : index
    %c0_5 = arith.constant 0 : index
    %1 = vector.load %arg2[%c0_3, %c0_4, %c0_5] : memref<2x8x64xf32, #tpu.memory_space<vmem>>, vector<2x8x64xf32>
    %c0_6 = arith.constant 0 : index
    %c0_7 = arith.constant 0 : index
    %c0_8 = arith.constant 0 : index
    %c0_9 = arith.constant 0 : index
    %2 = vector.load %arg3[%c0_6, %c0_7, %c0_8, %c0_9] : memref<2x4x4x8xf32, #tpu.memory_space<vmem>>, vector<2x4x4x8xf32>
    %3 = vector.extract_strided_slice %0 {offsets = [0, 0, 0, 0], sizes = [2, 1, 4, 8], strides = [1, 1, 1, 1]} : vector<2x4x4x8xf32> to vector<2x1x4x8xf32>
    %4 = vector.shape_cast %3 : vector<2x1x4x8xf32> to vector<2x4x8xf32>
    %5 = vector.extract_strided_slice %1 {offsets = [0, 0, 0], sizes = [2, 8, 8], strides = [1, 1, 1]} : vector<2x8x64xf32> to vector<2x8x8xf32>
    %6 = vector.extract_strided_slice %1 {offsets = [0, 0, 32], sizes = [2, 8, 8], strides = [1, 1, 1]} : vector<2x8x64xf32> to vector<2x8x8xf32>
    %cst = arith.constant dense<0.000000e+00> : vector<2x4x8xf32>
    %7 = tpu.matmul %4, %5, %cst {dimension_numbers = #tpu.dot_dimension_numbers<[2], [2], [1], [1], [0, 0, 0, 1, 1, 1], [0], [0]>} : vector<2x4x8xf32>, vector<2x8x8xf32>, vector<2x4x8xf32> -> vector<2x4x8xf32>
    %8 = vector.extract_strided_slice %2 {offsets = [0, 0, 0, 0], sizes = [2, 1, 4, 8], strides = [1, 1, 1, 1]} : vector<2x4x4x8xf32> to vector<2x1x4x8xf32>
    %9 = vector.shape_cast %8 : vector<2x1x4x8xf32> to vector<2x4x8xf32>
    %10 = arith.addf %7, %9 : vector<2x4x8xf32>
    %cst_10 = arith.constant dense<0xFF800000> : vector<2x4xf32>
    %11 = vector.multi_reduction <maximumf>, %10, %cst_10 [2] : vector<2x4x8xf32> to vector<2x4xf32>
    %12 = vector.shape_cast %11 : vector<2x4xf32> to vector<2x4x1xf32>
    %13 = vector.broadcast %12 : vector<2x4x1xf32> to vector<2x4x8xf32>
    %14 = arith.subf %10, %13 : vector<2x4x8xf32>
    %15 = math.exp %14 : vector<2x4x8xf32>
    %cst_11 = arith.constant dense<0.000000e+00> : vector<2x4xf32>
    %16 = vector.multi_reduction <add>, %15, %cst_11 [2] : vector<2x4x8xf32> to vector<2x4xf32>
    %17 = vector.shape_cast %16 : vector<2x4xf32> to vector<2x4x1xf32>
    %18 = tpu.reciprocal %17 : vector<2x4x1xf32> -> vector<2x4x1xf32>
    %19 = vector.broadcast %18 : vector<2x4x1xf32> to vector<2x4x8xf32>
    %20 = arith.mulf %15, %19 : vector<2x4x8xf32>
    %21 = vector.shape_cast %20 : vector<2x4x8xf32> to vector<2x1x4x8xf32>
    %cst_12 = arith.constant dense<0.000000e+00> : vector<2x4x8xf32>
    %22 = tpu.matmul %20, %6, %cst_12 {dimension_numbers = #tpu.dot_dimension_numbers<[2], [1], [1], [2], [0, 0, 0, 1, 1, 2], [0], [0]>} : vector<2x4x8xf32>, vector<2x8x8xf32>, vector<2x4x8xf32> -> vector<2x4x8xf32>
    %23 = vector.extract_strided_slice %0 {offsets = [0, 1, 0, 0], sizes = [2, 1, 4, 8], strides = [1, 1, 1, 1]} : vector<2x4x4x8xf32> to vector<2x1x4x8xf32>
    %24 = vector.shape_cast %23 : vector<2x1x4x8xf32> to vector<2x4x8xf32>
    %25 = vector.extract_strided_slice %1 {offsets = [0, 0, 8], sizes = [2, 8, 8], strides = [1, 1, 1]} : vector<2x8x64xf32> to vector<2x8x8xf32>
    %26 = vector.extract_strided_slice %1 {offsets = [0, 0, 40], sizes = [2, 8, 8], strides = [1, 1, 1]} : vector<2x8x64xf32> to vector<2x8x8xf32>
    %cst_13 = arith.constant dense<0.000000e+00> : vector<2x4x8xf32>
    %27 = tpu.matmul %24, %25, %cst_13 {dimension_numbers = #tpu.dot_dimension_numbers<[2], [2], [1], [1], [0, 0, 0, 1, 1, 1], [0], [0]>} : vector<2x4x8xf32>, vector<2x8x8xf32>, vector<2x4x8xf32> -> vector<2x4x8xf32>
    %28 = vector.extract_strided_slice %2 {offsets = [0, 1, 0, 0], sizes = [2, 1, 4, 8], strides = [1, 1, 1, 1]} : vector<2x4x4x8xf32> to vector<2x1x4x8xf32>
    %29 = vector.shape_cast %28 : vector<2x1x4x8xf32> to vector<2x4x8xf32>
    %30 = arith.addf %27, %29 : vector<2x4x8xf32>
    %cst_14 = arith.constant dense<0xFF800000> : vector<2x4xf32>
    %31 = vector.multi_reduction <maximumf>, %30, %cst_14 [2] : vector<2x4x8xf32> to vector<2x4xf32>
    %32 = vector.shape_cast %31 : vector<2x4xf32> to vector<2x4x1xf32>
    %33 = vector.broadcast %32 : vector<2x4x1xf32> to vector<2x4x8xf32>
    %34 = arith.subf %30, %33 : vector<2x4x8xf32>
    %35 = math.exp %34 : vector<2x4x8xf32>
    %cst_15 = arith.constant dense<0.000000e+00> : vector<2x4xf32>
    %36 = vector.multi_reduction <add>, %35, %cst_15 [2] : vector<2x4x8xf32> to vector<2x4xf32>
    %37 = vector.shape_cast %36 : vector<2x4xf32> to vector<2x4x1xf32>
    %38 = tpu.reciprocal %37 : vector<2x4x1xf32> -> vector<2x4x1xf32>
    %39 = vector.broadcast %38 : vector<2x4x1xf32> to vector<2x4x8xf32>
    %40 = arith.mulf %35, %39 : vector<2x4x8xf32>
    %41 = vector.shape_cast %40 : vector<2x4x8xf32> to vector<2x1x4x8xf32>
    %cst_16 = arith.constant dense<0.000000e+00> : vector<2x4x8xf32>
    %42 = tpu.matmul %40, %26, %cst_16 {dimension_numbers = #tpu.dot_dimension_numbers<[2], [1], [1], [2], [0, 0, 0, 1, 1, 2], [0], [0]>} : vector<2x4x8xf32>, vector<2x8x8xf32>, vector<2x4x8xf32> -> vector<2x4x8xf32>
    %43 = vector.extract_strided_slice %0 {offsets = [0, 2, 0, 0], sizes = [2, 1, 4, 8], strides = [1, 1, 1, 1]} : vector<2x4x4x8xf32> to vector<2x1x4x8xf32>
    %44 = vector.shape_cast %43 : vector<2x1x4x8xf32> to vector<2x4x8xf32>
    %45 = vector.extract_strided_slice %1 {offsets = [0, 0, 16], sizes = [2, 8, 8], strides = [1, 1, 1]} : vector<2x8x64xf32> to vector<2x8x8xf32>
    %46 = vector.extract_strided_slice %1 {offsets = [0, 0, 48], sizes = [2, 8, 8], strides = [1, 1, 1]} : vector<2x8x64xf32> to vector<2x8x8xf32>
    %cst_17 = arith.constant dense<0.000000e+00> : vector<2x4x8xf32>
    %47 = tpu.matmul %44, %45, %cst_17 {dimension_numbers = #tpu.dot_dimension_numbers<[2], [2], [1], [1], [0, 0, 0, 1, 1, 1], [0], [0]>} : vector<2x4x8xf32>, vector<2x8x8xf32>, vector<2x4x8xf32> -> vector<2x4x8xf32>
    %48 = vector.extract_strided_slice %2 {offsets = [0, 2, 0, 0], sizes = [2, 1, 4, 8], strides = [1, 1, 1, 1]} : vector<2x4x4x8xf32> to vector<2x1x4x8xf32>
    %49 = vector.shape_cast %48 : vector<2x1x4x8xf32> to vector<2x4x8xf32>
    %50 = arith.addf %47, %49 : vector<2x4x8xf32>
    %cst_18 = arith.constant dense<0xFF800000> : vector<2x4xf32>
    %51 = vector.multi_reduction <maximumf>, %50, %cst_18 [2] : vector<2x4x8xf32> to vector<2x4xf32>
    %52 = vector.shape_cast %51 : vector<2x4xf32> to vector<2x4x1xf32>
    %53 = vector.broadcast %52 : vector<2x4x1xf32> to vector<2x4x8xf32>
    %54 = arith.subf %50, %53 : vector<2x4x8xf32>
    %55 = math.exp %54 : vector<2x4x8xf32>
    %cst_19 = arith.constant dense<0.000000e+00> : vector<2x4xf32>
    %56 = vector.multi_reduction <add>, %55, %cst_19 [2] : vector<2x4x8xf32> to vector<2x4xf32>
    %57 = vector.shape_cast %56 : vector<2x4xf32> to vector<2x4x1xf32>
    %58 = tpu.reciprocal %57 : vector<2x4x1xf32> -> vector<2x4x1xf32>
    %59 = vector.broadcast %58 : vector<2x4x1xf32> to vector<2x4x8xf32>
    %60 = arith.mulf %55, %59 : vector<2x4x8xf32>
    %61 = vector.shape_cast %60 : vector<2x4x8xf32> to vector<2x1x4x8xf32>
    %cst_20 = arith.constant dense<0.000000e+00> : vector<2x4x8xf32>
    %62 = tpu.matmul %60, %46, %cst_20 {dimension_numbers = #tpu.dot_dimension_numbers<[2], [1], [1], [2], [0, 0, 0, 1, 1, 2], [0], [0]>} : vector<2x4x8xf32>, vector<2x8x8xf32>, vector<2x4x8xf32> -> vector<2x4x8xf32>
    %63 = vector.extract_strided_slice %0 {offsets = [0, 3, 0, 0], sizes = [2, 1, 4, 8], strides = [1, 1, 1, 1]} : vector<2x4x4x8xf32> to vector<2x1x4x8xf32>
    %64 = vector.shape_cast %63 : vector<2x1x4x8xf32> to vector<2x4x8xf32>
    %65 = vector.extract_strided_slice %1 {offsets = [0, 0, 24], sizes = [2, 8, 8], strides = [1, 1, 1]} : vector<2x8x64xf32> to vector<2x8x8xf32>
    %66 = vector.extract_strided_slice %1 {offsets = [0, 0, 56], sizes = [2, 8, 8], strides = [1, 1, 1]} : vector<2x8x64xf32> to vector<2x8x8xf32>
    %cst_21 = arith.constant dense<0.000000e+00> : vector<2x4x8xf32>
    %67 = tpu.matmul %64, %65, %cst_21 {dimension_numbers = #tpu.dot_dimension_numbers<[2], [2], [1], [1], [0, 0, 0, 1, 1, 1], [0], [0]>} : vector<2x4x8xf32>, vector<2x8x8xf32>, vector<2x4x8xf32> -> vector<2x4x8xf32>
    %68 = vector.extract_strided_slice %2 {offsets = [0, 3, 0, 0], sizes = [2, 1, 4, 8], strides = [1, 1, 1, 1]} : vector<2x4x4x8xf32> to vector<2x1x4x8xf32>
    %69 = vector.shape_cast %68 : vector<2x1x4x8xf32> to vector<2x4x8xf32>
    %70 = arith.addf %67, %69 : vector<2x4x8xf32>
    %cst_22 = arith.constant dense<0xFF800000> : vector<2x4xf32>
    %71 = vector.multi_reduction <maximumf>, %70, %cst_22 [2] : vector<2x4x8xf32> to vector<2x4xf32>
    %72 = vector.shape_cast %71 : vector<2x4xf32> to vector<2x4x1xf32>
    %73 = vector.broadcast %72 : vector<2x4x1xf32> to vector<2x4x8xf32>
    %74 = arith.subf %70, %73 : vector<2x4x8xf32>
    %75 = math.exp %74 : vector<2x4x8xf32>
    %cst_23 = arith.constant dense<0.000000e+00> : vector<2x4xf32>
    %76 = vector.multi_reduction <add>, %75, %cst_23 [2] : vector<2x4x8xf32> to vector<2x4xf32>
    %77 = vector.shape_cast %76 : vector<2x4xf32> to vector<2x4x1xf32>
    %78 = tpu.reciprocal %77 : vector<2x4x1xf32> -> vector<2x4x1xf32>
    %79 = vector.broadcast %78 : vector<2x4x1xf32> to vector<2x4x8xf32>
    %80 = arith.mulf %75, %79 : vector<2x4x8xf32>
    %81 = vector.shape_cast %80 : vector<2x4x8xf32> to vector<2x1x4x8xf32>
    %cst_24 = arith.constant dense<0.000000e+00> : vector<2x4x8xf32>
    %82 = tpu.matmul %80, %66, %cst_24 {dimension_numbers = #tpu.dot_dimension_numbers<[2], [1], [1], [2], [0, 0, 0, 1, 1, 2], [0], [0]>} : vector<2x4x8xf32>, vector<2x8x8xf32>, vector<2x4x8xf32> -> vector<2x4x8xf32>
    %83 = tpu.concatenate %22, %42, %62, %82 in 2 : vector<2x4x8xf32>, vector<2x4x8xf32>, vector<2x4x8xf32>, vector<2x4x8xf32> -> vector<2x4x32xf32>
    %c0_25 = arith.constant 0 : index
    %c0_26 = arith.constant 0 : index
    %c0_27 = arith.constant 0 : index
    %84 = vector.load %arg5[%c0_25, %c0_26, %c0_27] : memref<2x4x32xf32, #tpu.memory_space<vmem>>, vector<2x4x32xf32>
    tpu.vector_store %arg5[%c0_25, %c0_26, %c0_27], %83 {strides = array<i32>} : memref<2x4x32xf32, #tpu.memory_space<vmem>>, vector<2x4x32xf32>,
    %85 = tpu.concatenate %21, %41, %61, %81 in 1 : vector<2x1x4x8xf32>, vector<2x1x4x8xf32>, vector<2x1x4x8xf32>, vector<2x1x4x8xf32> -> vector<2x4x4x8xf32>
    %c0_28 = arith.constant 0 : index
    %c0_29 = arith.constant 0 : index
    %c0_30 = arith.constant 0 : index
    %c0_31 = arith.constant 0 : index
    %86 = vector.load %arg4[%c0_28, %c0_29, %c0_30, %c0_31] : memref<2x4x4x8xf32, #tpu.memory_space<vmem>>, vector<2x4x4x8xf32>
    tpu.vector_store %arg4[%c0_28, %c0_29, %c0_30, %c0_31], %85 {strides = array<i32>} : memref<2x4x4x8xf32, #tpu.memory_space<vmem>>, vector<2x4x4x8xf32>,
    return
  }
  func.func @transform_0(%arg0: i32) -> (i32, i32, i32, i32) {
    %c0_i32 = arith.constant 0 : i32
    %c0_i32_0 = arith.constant 0 : i32
    %c0_i32_1 = arith.constant 0 : i32
    %c0_i32_2 = arith.constant 0 : i32
    return %arg0, %c0_i32, %c0_i32_0, %c0_i32_1 : i32, i32, i32, i32
  }
  func.func @transform_1(%arg0: i32) -> (i32, i32, i32) {
    %c0_i32 = arith.constant 0 : i32
    %c0_i32_0 = arith.constant 0 : i32
    %c0_i32_1 = arith.constant 0 : i32
    return %arg0, %c0_i32, %c0_i32_0 : i32, i32, i32
  }
  func.func @transform_2(%arg0: i32) -> (i32, i32, i32, i32) {
    %c0_i32 = arith.constant 0 : i32
    %c0_i32_0 = arith.constant 0 : i32
    %c0_i32_1 = arith.constant 0 : i32
    %c0_i32_2 = arith.constant 0 : i32
    return %arg0, %c0_i32, %c0_i32_0, %c0_i32_1 : i32, i32, i32, i32
  }
  func.func @transform_3(%arg0: i32) -> (i32, i32, i32, i32) {
    %c0_i32 = arith.constant 0 : i32
    %c0_i32_0 = arith.constant 0 : i32
    %c0_i32_1 = arith.constant 0 : i32
    %c0_i32_2 = arith.constant 0 : i32
    return %arg0, %c0_i32, %c0_i32_0, %c0_i32_1 : i32, i32, i32, i32
  }
  func.func @transform_4(%arg0: i32) -> (i32, i32, i32) {
    %c0_i32 = arith.constant 0 : i32
    %c0_i32_0 = arith.constant 0 : i32
    %c0_i32_1 = arith.constant 0 : i32
    return %arg0, %c0_i32, %c0_i32_0 : i32, i32, i32
  }
}

module attributes {stable_mosaic.version = 11 : i64} {
  func.func @_linear_kernel(%arg0: i32, %arg1: memref<16x32xf32, #tpu.memory_space<vmem>>, %arg2: memref<32x32xf32, #tpu.memory_space<vmem>>, %arg3: memref<1x32xf32, #tpu.memory_space<vmem>>, %arg4: memref<16x32xf32, #tpu.memory_space<vmem>>) attributes {dimension_semantics = [#tpu.dimension_semantics<parallel>], iteration_bounds = array<i64: 1>, scalar_prefetch = 0 : i64, scratch_operands = 0 : i64, tpu.core_type = #tpu.core_type<tc>, window_params = [{transform_indices = @transform_0, window_bounds = array<i64: 16, 32>}, {pipeline_mode = #tpu.pipeline_mode<synchronous>, transform_indices = @transform_1, window_bounds = array<i64: 32, 32>}, {pipeline_mode = #tpu.pipeline_mode<synchronous>, transform_indices = @transform_2, window_bounds = array<i64: 1, 32>}, {transform_indices = @transform_3, window_bounds = array<i64: 16, 32>}]} {
    %c0 = arith.constant 0 : index
    %c0_0 = arith.constant 0 : index
    %0 = vector.load %arg1[%c0, %c0_0] : memref<16x32xf32, #tpu.memory_space<vmem>>, vector<16x32xf32>
    %c0_1 = arith.constant 0 : index
    %c0_2 = arith.constant 0 : index
    %1 = vector.load %arg2[%c0_1, %c0_2] : memref<32x32xf32, #tpu.memory_space<vmem>>, vector<32x32xf32>
    %cst = arith.constant dense<0.000000e+00> : vector<16x32xf32>
    %2 = tpu.matmul %0, %1, %cst {dimension_numbers = #tpu.dot_dimension_numbers<[1], [0], [0], [1], [0, 0, 1, 1], [], []>} : vector<16x32xf32>, vector<32x32xf32>, vector<16x32xf32> -> vector<16x32xf32>
    %c0_3 = arith.constant 0 : index
    %c0_4 = arith.constant 0 : index
    %3 = vector.load %arg3[%c0_3, %c0_4] : memref<1x32xf32, #tpu.memory_space<vmem>>, vector<1x32xf32>
    %4 = vector.broadcast %3 : vector<1x32xf32> to vector<16x32xf32>
    %5 = arith.addf %2, %4 : vector<16x32xf32>
    %c0_5 = arith.constant 0 : index
    %c0_6 = arith.constant 0 : index
    %6 = vector.load %arg4[%c0_5, %c0_6] : memref<16x32xf32, #tpu.memory_space<vmem>>, vector<16x32xf32>
    tpu.vector_store %arg4[%c0_5, %c0_6], %5 {strides = array<i32>} : memref<16x32xf32, #tpu.memory_space<vmem>>, vector<16x32xf32>,
    return
  }
  func.func @transform_0(%arg0: i32) -> (i32, i32) {
    %c0_i32 = arith.constant 0 : i32
    %c0_i32_0 = arith.constant 0 : i32
    return %arg0, %c0_i32 : i32, i32
  }
  func.func @transform_1(%arg0: i32) -> (i32, i32) {
    %c0_i32 = arith.constant 0 : i32
    %c0_i32_0 = arith.constant 0 : i32
    %c0_i32_1 = arith.constant 0 : i32
    return %c0_i32, %c0_i32_0 : i32, i32
  }
  func.func @transform_2(%arg0: i32) -> (i32, i32) {
    %c0_i32 = arith.constant 0 : i32
    %c0_i32_0 = arith.constant 0 : i32
    %c0_i32_1 = arith.constant 0 : i32
    return %c0_i32, %c0_i32_0 : i32, i32
  }
  func.func @transform_3(%arg0: i32) -> (i32, i32) {
    %c0_i32 = arith.constant 0 : i32
    %c0_i32_0 = arith.constant 0 : i32
    return %arg0, %c0_i32 : i32, i32
  }
}

</mosaic_0001>

<bundles_post_ra>
// kernel: strided_local_relpos_mhsa.6
= control target key start
LH: loop header
LB: loop body
LE: loop exit
PB: predicated region body
PF: predicated region fallthrough
CT: control target
= control target key end

     0   :  { %vm24_vm0 = vcmask 261120   ;;  %s114_s1 = inlined_call_operand.vmem [shape: f32[32,32], index: 1, kind: input, shape index: {}]   ;;  %s115_s2 = inlined_call_operand.vmem [shape: f32[1,32], index: 2, kind: input, shape index: {}]   ;;  %s116_s0 = inlined_call_operand.vmem [shape: f32[16,32], index: 0, kind: input, shape index: {}]   ;;  %s117_s3 = inlined_call_operand.vmem [shape: f32[16,32], index: 3, kind: output, shape index: {}]  }
   0x1   :  { %v19_v0 = vld [vmem:[%s114_s1 + $0x18] sm:$0xff]  ;;  %v18_v1 = vld [vmem:[%s114_s1 + $0x10] sm:$0xff]  ;;  %v17_v2 = vld [vmem:[%s114_s1 + $0x8] sm:$0xff] }
   0x2   :  { %43 = vmatpush.msra.mxu0 %v19_v0  ;;  %62 = vmatpush.msra.mxu1 %v19_v0  ;;  %v16_v3 = vld [vmem:[%s114_s1] sm:$0xff]  ;;  %v15_v5 = vld [vmem:[%s116_s0 + $0x8] sm:$0xff] }
   0x3   :  { %v14_v4 = vld [vmem:[%s116_s0] sm:$0xff] }
   0x4   :  { %44 = vmatpush.msra.mxu0 %v18_v1  ;;  %63 = vmatpush.msra.mxu1 %v18_v1  ;;  %v66_v6 = vld [vmem:[%s115_s2] ss:$0 sm:$0xff] }
   0x6   :  { %45 = vmatpush.msra.mxu0 %v17_v2  ;;  %64 = vmatpush.msra.mxu1 %v17_v2 }
   0x8   :  { %46 = vmatpush.msra.mxu0 %v16_v3  ;;  %65 = vmatpush.msra.mxu1 %v16_v3 }
   0x9   :  { %60 = vmatmul.msk.f32.vlgmr.msra.gmra.mxu0 %vm24_vm0, %v14_v4  ;;  %61 = vmatmul.msk.f32.vlgmr.msra.gmra.mxu1 %vm24_vm0, %v15_v5 }
  0x86   :  { %v48_v7 = vpop.f32.mrf.mxu0  ;;  %v51_v8 = vpop.f32.mrf.mxu1 }
  0x87   :  { %v49_v9 = vadd.f32 %v66_v6, %v48_v7  ;;  %v52_v10 = vadd.f32 %v66_v6, %v51_v8 }
  0x89   :  { %54 = vst.msk [vmem:[%s117_s3] sm:$0xff] %vm24_vm0, %v49_v9 }
  0x8a   :  { %55 = vst.msk [vmem:[%s117_s3 + $0x8] sm:$0xff] %vm24_vm0, %v52_v10 }

// kernel: strided_local_relpos_mhsa.8
= control target key start
LH: loop header
LB: loop body
LE: loop exit
PB: predicated region body
PF: predicated region fallthrough
CT: control target
= control target key end

     0   :  { %vm24_vm0 = vcmask 261120   ;;  %vm55_vm1 = vcmask 260096   ;;  %s115_s1 = inlined_call_operand.vmem [shape: f32[32,32], index: 1, kind: input, shape index: {}]   ;;  %s116_s2 = inlined_call_operand.vmem [shape: f32[1,32], index: 2, kind: input, shape index: {}]   ;;  %s117_s0 = inlined_call_operand.vmem [shape: f32[15,32], index: 0, kind: input, shape index: {}]   ;;  %s118_s3 = inlined_call_operand.vmem [shape: f32[15,32], index: 3, kind: output, shape index: {}]  }
   0x1   :  { %v19_v0 = vld [vmem:[%s115_s1 + $0x18] sm:$0xff]  ;;  %v18_v1 = vld [vmem:[%s115_s1 + $0x10] sm:$0xff]  ;;  %v17_v2 = vld [vmem:[%s115_s1 + $0x8] sm:$0xff] }
   0x2   :  { %43 = vmatpush.msra.mxu0 %v19_v0  ;;  %63 = vmatpush.msra.mxu1 %v19_v0  ;;  %v16_v3 = vld [vmem:[%s115_s1] sm:$0xff]  ;;  %v15_v5 = vld [vmem:[%s117_s0 + $0x8] sm:$0x7f] }
   0x3   :  { %v14_v4 = vld [vmem:[%s117_s0] sm:$0xff] }
   0x4   :  { %44 = vmatpush.msra.mxu0 %v18_v1  ;;  %64 = vmatpush.msra.mxu1 %v18_v1  ;;  %v67_v6 = vld [vmem:[%s116_s2] ss:$0 sm:$0xff] }
   0x6   :  { %45 = vmatpush.msra.mxu0 %v17_v2  ;;  %65 = vmatpush.msra.mxu1 %v17_v2 }
   0x8   :  { %46 = vmatpush.msra.mxu0 %v16_v3  ;;  %66 = vmatpush.msra.mxu1 %v16_v3 }
   0x9   :  { %61 = vmatmul.msk.f32.vlgmr.msra.gmra.mxu0 %vm24_vm0, %v14_v4  ;;  %62 = vmatmul.msk.f32.vlgmr.msra.gmra.mxu1 %vm24_vm0, %v15_v5 }
  0x86   :  { %v48_v7 = vpop.f32.mrf.mxu0  ;;  %v51_v8 = vpop.f32.mrf.mxu1 }
  0x87   :  { %v49_v9 = vadd.f32 %v67_v6, %v48_v7  ;;  %v52_v10 = vadd.f32 %v67_v6, %v51_v8 }
  0x89   :  { %54 = vst.msk [vmem:[%s118_s3] sm:$0xff] %vm24_vm0, %v49_v9 }
  0x8a   :  { %56 = vst.msk [vmem:[%s118_s3 + $0x8] sm:$0x7f] %vm55_vm1, %v52_v10 }

// kernel: strided_local_relpos_mhsa.9
= control target key start
LH: loop header
LB: loop body
LE: loop exit
PB: predicated region body
PF: predicated region fallthrough
CT: control target
= control target key end

     0   :  { %s759_s9 = smov 0   ;;  %s761_s10 = smov 0   ;;  %s1059_s0 = inlined_call_operand.vmem [shape: f32[2,4,8,8], index: 0, kind: input, shape index: {}]   ;;  %s1060_s1 = inlined_call_operand.vmem [shape: f32[4,128,8], index: 1, kind: input, shape index: {}]   ;;  %s1061_s2 = inlined_call_operand.vmem [shape: f32[2,4,8,128], index: 2, kind: output, shape index: {}]  }
   0x1   :  { %s763_s11 = smov 0  }
   0x2 LB: > { %s24_s12 = sadd.s32 1, %s738_s10  ;;  %p619_p0 = scmp.ge.s32.totalorder %s742_s11, 1  ;;  %s742_s11 = sphi %s763_s11, %s12_s11   ;;  %s738_s10 = sphi %s761_s10, %s1063_s10   ;;  %s734_s9 = sphi %s759_s9, %s1062_s9  }
   0x3   : > { %p26_p1 = scmp.ge.s32.totalorder %s24_s12, 2  ;;  %p131_p2 = scmp.lt.s32.totalorder %s742_s11, 3 }
   0x5   : > { %s1065_s12 = smov (%p26_p1, %s24_s12), 0  ;;  %p132_p3 = pnand %p619_p0, %p131_p2 }
   0x6   : > { %p159_p4 = scmp.lt.s32.totalorder (!%p132_p3), %s734_s9, 1 }
   0x7   : > { %135 = sbr.rel (%p132_p3) target bundleno = 210 (0xd2), region = 28 }
   0xc   : > { %v226_v0 = vld [vmem:[%s1060_s1 + $0x178] sm:$0xff]  ;;  %vm243_vm0 = vcmask 64512   ;;  %v225_v4 = vld [vmem:[%s1060_s1 + $0x170] sm:$0xff]  ;;  %v224_v8 = vld [vmem:[%s1060_s1 + $0x168] sm:$0xff]  ;;  %s1067_s9 = smov (!%p159_p4, %s734_s9), 1 }
   0xd   : > { %v242_v1 = vld [vmem:[%s1060_s1 + $0x1f8] sm:$0xff]  ;;  %658 = vmatpush.xpose.msk.msra.mxu2 %vm243_vm0, %v226_v0  ;;  %v241_v5 = vld [vmem:[%s1060_s1 + $0x1f0] sm:$0xff]  ;;  %v240_v9 = vld [vmem:[%s1060_s1 + $0x1e8] sm:$0xff]  ;;  %s694_s13 = sshll.u32 %s1067_s9, 5 }
   0xe   : > { %675 = vmatpush.xpose.msk.msra.mxu3 %vm243_vm0, %v242_v1  ;;  %v194_v2 = vld [vmem:[%s1060_s1 + $0x78] sm:$0xff]  ;;  %v193_v6 = vld [vmem:[%s1060_s1 + $0x70] sm:$0xff]  ;;  %v192_v10 = vld [vmem:[%s1060_s1 + $0x68] sm:$0xff]  ;;  %s166_s9 = scalar_lea.vmem %s1059_s0, %s694_s13  ;;  %s174_s26 = scalar_lea.vmem %s1061_s2, %s694_s13 }
   0xf   : > { %v210_v3 = vld [vmem:[%s1060_s1 + $0xf8] sm:$0xff]  ;;  %624 = vmatpush.xpose.msk.msra.mxu0 %vm243_vm0, %v194_v2  ;;  %v209_v7 = vld [vmem:[%s1060_s1 + $0xf0] sm:$0xff]  ;;  %v208_v11 = vld [vmem:[%s1060_s1 + $0xe8] sm:$0xff] }
  0x10   : > { %641 = vmatpush.xpose.msk.msra.mxu1 %vm243_vm0, %v210_v3  ;;  %v223_v12 = vld [vmem:[%s1060_s1 + $0x160] sm:$0xff]  ;;  %v222_v16 = vld [vmem:[%s1060_s1 + $0x158] sm:$0xff]  ;;  %v221_v20 = vld [vmem:[%s1060_s1 + $0x150] sm:$0xff] }
  0x11   : > { %659 = vmatpush.xpose.msk.msra.mxu2 %vm243_vm0, %v225_v4  ;;  %v239_v13 = vld [vmem:[%s1060_s1 + $0x1e0] sm:$0xff]  ;;  %v238_v17 = vld [vmem:[%s1060_s1 + $0x1d8] sm:$0xff]  ;;  %v237_v21 = vld [vmem:[%s1060_s1 + $0x1d0] sm:$0xff] }
  0x12   : > { %676 = vmatpush.xpose.msk.msra.mxu3 %vm243_vm0, %v241_v5  ;;  %v191_v14 = vld [vmem:[%s1060_s1 + $0x60] sm:$0xff]  ;;  %v190_v18 = vld [vmem:[%s1060_s1 + $0x58] sm:$0xff]  ;;  %v189_v22 = vld [vmem:[%s1060_s1 + $0x50] sm:$0xff] }
  0x13   : > { %625 = vmatpush.xpose.msk.msra.mxu0 %vm243_vm0, %v193_v6  ;;  %v207_v15 = vld [vmem:[%s1060_s1 + $0xe0] sm:$0xff]  ;;  %v206_v19 = vld [vmem:[%s1060_s1 + $0xd8] sm:$0xff]  ;;  %v205_v23 = vld [vmem:[%s1060_s1 + $0xd0] sm:$0xff] }
  0x14   : > { %642 = vmatpush.xpose.msk.msra.mxu1 %vm243_vm0, %v209_v7  ;;  %v220_v24 = vld [vmem:[%s1060_s1 + $0x148] sm:$0xff]  ;;  %v219_v28 = vld [vmem:[%s1060_s1 + $0x140] sm:$0xff]  ;;  %v218_v32 = vld [vmem:[%s1060_s1 + $0x138] sm:$0xff] }
  0x15   : > { %660 = vmatpush.xpose.msk.msra.mxu2 %vm243_vm0, %v224_v8  ;;  %v236_v25 = vld [vmem:[%s1060_s1 + $0x1c8] sm:$0xff]  ;;  %v235_v29 = vld [vmem:[%s1060_s1 + $0x1c0] sm:$0xff]  ;;  %v234_v33 = vld [vmem:[%s1060_s1 + $0x1b8] sm:$0xff] }
  0x16   : > { %677 = vmatpush.xpose.msk.msra.mxu3 %vm243_vm0, %v240_v9  ;;  %v188_v26 = vld [vmem:[%s1060_s1 + $0x48] sm:$0xff]  ;;  %v187_v30 = vld [vmem:[%s1060_s1 + $0x40] sm:$0xff]  ;;  %v186_v34 = vld [vmem:[%s1060_s1 + $0x38] sm:$0xff] }
  0x17   : > { %626 = vmatpush.xpose.msk.msra.mxu0 %vm243_vm0, %v192_v10  ;;  %v204_v27 = vld [vmem:[%s1060_s1 + $0xc8] sm:$0xff]  ;;  %v203_v31 = vld [vmem:[%s1060_s1 + $0xc0] sm:$0xff]  ;;  %v202_v35 = vld [vmem:[%s1060_s1 + $0xb8] sm:$0xff] }
  0x18   : > { %643 = vmatpush.xpose.msk.msra.mxu1 %vm243_vm0, %v208_v11  ;;  %v217_v36 = vld [vmem:[%s1060_s1 + $0x130] sm:$0xff]  ;;  %v216_v40 = vld [vmem:[%s1060_s1 + $0x128] sm:$0xff]  ;;  %v215_v44 = vld [vmem:[%s1060_s1 + $0x120] sm:$0xff] }
  0x19   : > { %661 = vmatpush.xpose.msk.msra.mxu2 %vm243_vm0, %v223_v12  ;;  %v233_v37 = vld [vmem:[%s1060_s1 + $0x1b0] sm:$0xff]  ;;  %v232_v41 = vld [vmem:[%s1060_s1 + $0x1a8] sm:$0xff]  ;;  %v231_v45 = vld [vmem:[%s1060_s1 + $0x1a0] sm:$0xff] }
  0x1a   : > { %678 = vmatpush.xpose.msk.msra.mxu3 %vm243_vm0, %v239_v13  ;;  %v185_v38 = vld [vmem:[%s1060_s1 + $0x30] sm:$0xff]  ;;  %v184_v42 = vld [vmem:[%s1060_s1 + $0x28] sm:$0xff]  ;;  %v183_v46 = vld [vmem:[%s1060_s1 + $0x20] sm:$0xff] }
  0x1b   : > { %627 = vmatpush.xpose.msk.msra.mxu0 %vm243_vm0, %v191_v14  ;;  %v201_v39 = vld [vmem:[%s1060_s1 + $0xb0] sm:$0xff]  ;;  %v200_v43 = vld [vmem:[%s1060_s1 + $0xa8] sm:$0xff]  ;;  %v199_v47 = vld [vmem:[%s1060_s1 + $0xa0] sm:$0xff] }
  0x1c   : > { %644 = vmatpush.xpose.msk.msra.mxu1 %vm243_vm0, %v207_v15  ;;  %v214_v48 = vld [vmem:[%s1060_s1 + $0x118] sm:$0xff]  ;;  %v213_v52 = vld [vmem:[%s1060_s1 + $0x110] sm:$0xff]  ;;  %v212_v56 = vld [vmem:[%s1060_s1 + $0x108] sm:$0xff] }
  0x1d   : > { %662 = vmatpush.xpose.msk.msra.mxu2 %vm243_vm0, %v222_v16  ;;  %v230_v49 = vld [vmem:[%s1060_s1 + $0x198] sm:$0xff]  ;;  %v229_v53 = vld [vmem:[%s1060_s1 + $0x190] sm:$0xff]  ;;  %v228_v57 = vld [vmem:[%s1060_s1 + $0x188] sm:$0xff] }
  0x1e   : > { %679 = vmatpush.xpose.msk.msra.mxu3 %vm243_vm0, %v238_v17  ;;  %v182_v50 = vld [vmem:[%s1060_s1 + $0x18] sm:$0xff]  ;;  %v181_v54 = vld [vmem:[%s1060_s1 + $0x10] sm:$0xff]  ;;  %v180_v58 = vld [vmem:[%s1060_s1 + $0x8] sm:$0xff] }
  0x1f   : > { %628 = vmatpush.xpose.msk.msra.mxu0 %vm243_vm0, %v190_v18  ;;  %v198_v51 = vld [vmem:[%s1060_s1 + $0x98] sm:$0xff]  ;;  %v197_v55 = vld [vmem:[%s1060_s1 + $0x90] sm:$0xff]  ;;  %v196_v59 = vld [vmem:[%s1060_s1 + $0x88] sm:$0xff] }
  0x20   : > { %645 = vmatpush.xpose.msk.msra.mxu1 %vm243_vm0, %v206_v19  ;;  %v211_v60 = vld [vmem:[%s1060_s1 + $0x100] sm:$0xff]  ;;  %v177_v0 = vld [vmem:[%s166_s9 + $0x10] sm:$0xff]  ;;  %v178_v1 = vld [vmem:[%s166_s9 + $0x18] sm:$0xff] }
  0x21   : > { %663 = vmatpush.xpose.msk.msra.mxu2 %vm243_vm0, %v221_v20  ;;  %v227_v61 = vld [vmem:[%s1060_s1 + $0x180] sm:$0xff]  ;;  %v176_v3 = vld [vmem:[%s166_s9 + $0x8] sm:$0xff] }
  0x22   : > { %680 = vmatpush.xpose.msk.msra.mxu3 %vm243_vm0, %v237_v21  ;;  %v179_v62 = vld [vmem:[%s1060_s1] sm:$0xff] }
  0x23   : > { %629 = vmatpush.xpose.msk.msra.mxu0 %vm243_vm0, %v189_v22  ;;  %v195_v63 = vld [vmem:[%s1060_s1 + $0x80] sm:$0xff] }
  0x24   : > { %646 = vmatpush.xpose.msk.msra.mxu1 %vm243_vm0, %v205_v23  ;;  %v175_v2 = vld [vmem:[%s166_s9] sm:$0xff] }
  0x25   : > { %664 = vmatpush.xpose.msk.msra.mxu2 %vm243_vm0, %v220_v24 }
  0x26   : > { %681 = vmatpush.xpose.msk.msra.mxu3 %vm243_vm0, %v236_v25 }
  0x27   : > { %630 = vmatpush.xpose.msk.msra.mxu0 %vm243_vm0, %v188_v26 }
  0x28   : > { %647 = vmatpush.xpose.msk.msra.mxu1 %vm243_vm0, %v204_v27 }
  0x29   : > { %665 = vmatpush.xpose.msk.msra.mxu2 %vm243_vm0, %v219_v28 }
  0x2a   : > { %682 = vmatpush.xpose.msk.msra.mxu3 %vm243_vm0, %v235_v29 }
  0x2b   : > { %631 = vmatpush.xpose.msk.msra.mxu0 %vm243_vm0, %v187_v30 }
  0x2c   : > { %648 = vmatpush.xpose.msk.msra.mxu1 %vm243_vm0, %v203_v31 }
  0x2d   : > { %666 = vmatpush.xpose.msk.msra.mxu2 %vm243_vm0, %v218_v32 }
  0x2e   : > { %683 = vmatpush.xpose.msk.msra.mxu3 %vm243_vm0, %v234_v33 }
  0x2f   : > { %632 = vmatpush.xpose.msk.msra.mxu0 %vm243_vm0, %v186_v34 }
  0x30   : > { %649 = vmatpush.xpose.msk.msra.mxu1 %vm243_vm0, %v202_v35 }
  0x31   : > { %667 = vmatpush.xpose.msk.msra.mxu2 %vm243_vm0, %v217_v36 }
  0x32   : > { %684 = vmatpush.xpose.msk.msra.mxu3 %vm243_vm0, %v233_v37 }
  0x33   : > { %633 = vmatpush.xpose.msk.msra.mxu0 %vm243_vm0, %v185_v38 }
  0x34   : > { %650 = vmatpush.xpose.msk.msra.mxu1 %vm243_vm0, %v201_v39 }
  0x35   : > { %668 = vmatpush.xpose.msk.msra.mxu2 %vm243_vm0, %v216_v40 }
  0x36   : > { %685 = vmatpush.xpose.msk.msra.mxu3 %vm243_vm0, %v232_v41 }
  0x37   : > { %634 = vmatpush.xpose.msk.msra.mxu0 %vm243_vm0, %v184_v42 }
  0x38   : > { %651 = vmatpush.xpose.msk.msra.mxu1 %vm243_vm0, %v200_v43 }
  0x39   : > { %669 = vmatpush.xpose.msk.msra.mxu2 %vm243_vm0, %v215_v44 }
  0x3a   : > { %686 = vmatpush.xpose.msk.msra.mxu3 %vm243_vm0, %v231_v45 }
  0x3b   : > { %635 = vmatpush.xpose.msk.msra.mxu0 %vm243_vm0, %v183_v46 }
  0x3c   : > { %652 = vmatpush.xpose.msk.msra.mxu1 %vm243_vm0, %v199_v47 }
  0x3d   : > { %670 = vmatpush.xpose.msk.msra.mxu2 %vm243_vm0, %v214_v48 }
  0x3e   : > { %687 = vmatpush.xpose.msk.msra.mxu3 %vm243_vm0, %v230_v49 }
  0x3f   : > { %636 = vmatpush.xpose.msk.msra.mxu0 %vm243_vm0, %v182_v50 }
  0x40   : > { %653 = vmatpush.xpose.msk.msra.mxu1 %vm243_vm0, %v198_v51 }
  0x41   : > { %671 = vmatpush.xpose.msk.msra.mxu2 %vm243_vm0, %v213_v52 }
  0x42   : > { %688 = vmatpush.xpose.msk.msra.mxu3 %vm243_vm0, %v229_v53 }
  0x43   : > { %637 = vmatpush.xpose.msk.msra.mxu0 %vm243_vm0, %v181_v54 }
  0x44   : > { %654 = vmatpush.xpose.msk.msra.mxu1 %vm243_vm0, %v197_v55 }
  0x45   : > { %672 = vmatpush.xpose.msk.msra.mxu2 %vm243_vm0, %v212_v56 }
  0x46   : > { %689 = vmatpush.xpose.msk.msra.mxu3 %vm243_vm0, %v228_v57 }
  0x47   : > { %638 = vmatpush.xpose.msk.msra.mxu0 %vm243_vm0, %v180_v58 }
  0x48   : > { %655 = vmatpush.xpose.msk.msra.mxu1 %vm243_vm0, %v196_v59 }
  0x49   : > { %673 = vmatpush.xpose.msk.msra.mxu2 %vm243_vm0, %v211_v60 }
  0x4a   : > { %690 = vmatpush.xpose.msk.msra.mxu3 %vm243_vm0, %v227_v61 }
  0x4b   : > { %639 = vmatpush.xpose.msk.msra.mxu0 %vm243_vm0, %v179_v62 }
  0x4c   : > { %656 = vmatpush.xpose.msk.msra.mxu1 %vm243_vm0, %v195_v63  ;;  %674 = vmatmul.msk.f32.vlgmr.msra.gmra.mxu2 %vm243_vm0, %v177_v0 }
  0x4d   : > { %691 = vmatmul.msk.f32.vlgmr.msra.gmra.mxu3 %vm243_vm0, %v178_v1 }
  0x4e   : > { %640 = vmatmul.msk.f32.vlgmr.msra.gmra.mxu0 %vm243_vm0, %v175_v2 }
  0x4f   : > { %657 = vmatmul.msk.f32.vlgmr.msra.gmra.mxu1 %vm243_vm0, %v176_v3 }
  0xcb   : > { %v312_v4 = vpop.f32.mrf.mxu0 }
  0xcc   : > { %v383_v5 = vpop.f32.mrf.mxu1  ;;  %528 = vst [vmem:[%s174_s26] sm:$0xff] %v312_v4 }
  0xcd   : > { %529 = vst [vmem:[%s174_s26 + $0x8] sm:$0xff] %v383_v5 }
  0xcf   : > { %v454_v6 = vpop.f32.mrf.mxu2 }
  0xd0   : > { %v525_v7 = vpop.f32.mrf.mxu3  ;;  %530 = vst [vmem:[%s174_s26 + $0x10] sm:$0xff] %v454_v6 }
  0xd1   : > { %531 = vst [vmem:[%s174_s26 + $0x18] sm:$0xff] %v525_v7 }
  0xd2 PF: > { %s12_s11 = sadd.s32 1, %s742_s11   ;;  %s1062_s9 = smov %s738_s10 }
  0xd3   : > { %p9_p5 = scmp.ge.s32.totalorder %s12_s11, 4   ;;  %s1063_s10 = smov %s1065_s12 }
  0xd5   :  { %11 = sbr.rel (!%p9_p5) target bundleno = 2 (0x2), region = 58 }

// kernel: strided_local_relpos_mhsa.7
= control target key start
LH: loop header
LB: loop body
LE: loop exit
PB: predicated region body
PF: predicated region fallthrough
CT: control target
= control target key end

     0   :  { %s327_s12 = smov 0   ;;  %s359_s0 = inlined_call_operand.vmem [shape: f32[32,32], index: 0, kind: input, shape index: {}]   ;;  %s360_s1 = inlined_call_operand.vmem [shape: f32[32,64], index: 1, kind: input, shape index: {}]   ;;  %s361_s2 = inlined_call_operand.vmem [shape: f32[1,64], index: 2, kind: input, shape index: {}]   ;;  %s362_s3 = inlined_call_operand.vmem [shape: f32[32,64], index: 3, kind: output, shape index: {}]  }
   0x1 LB: > { %s273_s13 = sadd.s32 4294967295, %s305_s12   ;;  %p277_p0 = scmp.ge.s32.totalorder %s305_s12, 1  ;;  %s305_s12 = sphi %s327_s12, %s13_s12  }
   0x2   : > { %p138_p1 = scmp.lt.s32.totalorder %s305_s12, 3 }
   0x4   : > { %p139_p2 = pnand %p277_p0, %p138_p1 }
   0x5   : > { %s278_s18 = sshll.u32 (!%p139_p2), %s273_s13, 1 }
   0x6   : > { %142 = sbr.rel (%p139_p2) target bundleno = 149 (0x95), region = 32  ;;  %p163_p3 = scmp.lt.s32.totalorder (!%p139_p2), %s278_s18, 3 }
   0xb   : > { %v179_v0 = vld [vmem:[%s360_s1 + $0x18] sm:$0xff]  ;;  %v178_v1 = vld [vmem:[%s360_s1 + $0x10] sm:$0xff]  ;;  %v177_v2 = vld [vmem:[%s360_s1 + $0x8] sm:$0xff]  ;;  %s364_s18 = smov (!%p163_p3, %s278_s18), 3  ;;  %vm184_vm0 = vcmask 261120   ;;  %vm214_vm1 = vcmask 523264  }
   0xc   : > { %203 = vmatpush.msra.mxu0 %v179_v0  ;;  %286 = vmatpush.msra.mxu1 %v179_v0  ;;  %v176_v3 = vld [vmem:[%s360_s1] sm:$0xff]  ;;  %s279_s23 = sshll.u32 %s364_s18, 3 }
   0xd   : > { %s166_s26 = scalar_lea.vmem %s359_s0, %s279_s23  ;;  %v298_v6 = vld [vmem:[%s361_s2] ss:$0 sm:$0xff]  ;;  %s172_s4 = scalar_lea.vmem %s362_s3, %s279_s23 }
   0xe   : > { %204 = vmatpush.msra.mxu0 %v178_v1  ;;  %287 = vmatpush.msra.mxu1 %v178_v1  ;;  %v174_v4 = vld [vmem:[%s166_s26] sm:$0xff]  ;;  %v175_v5 = vld [vmem:[%s166_s26 + $0x8] sm:$0xff] }
  0x10   : > { %205 = vmatpush.msra.mxu0 %v177_v2  ;;  %288 = vmatpush.msra.mxu1 %v177_v2 }
  0x12   : > { %206 = vmatpush.msra.mxu0 %v176_v3  ;;  %289 = vmatpush.msra.mxu1 %v176_v3 }
  0x13   : > { %282 = vmatmul.msk.f32.vlgmr.msra.gmra.mxu0 %vm184_vm0, %v174_v4  ;;  %283 = vmatmul.msk.f32.vlgmr.msra.gmra.mxu1 %vm184_vm0, %v175_v5 }
  0x90   : > { %v208_v7 = vpop.f32.mrf.mxu0  ;;  %v211_v8 = vpop.f32.mrf.mxu1 }
  0x91   : > { %v209_v9 = vadd.f32 %v298_v6, %v208_v7  ;;  %v212_v10 = vadd.f32 %v298_v6, %v211_v8 }
  0x93   : > { %215 = vst.msk [vmem:[%s172_s4] sm:$0xff] %vm214_vm1, %v209_v9 }
  0x94   : > { %216 = vst.msk [vmem:[%s172_s4 + $0x8] sm:$0xff] %vm214_vm1, %v212_v10 }
  0x95 PF: > { %s13_s12 = sadd.s32 1, %s305_s12  }
  0x96   : > { %p10_p4 = scmp.ge.s32.totalorder %s13_s12, 4  }
  0x98   :  { %12 = sbr.rel (!%p10_p4) target bundleno = 1 (0x1), region = 62 }

// kernel: strided_local_relpos_mhsa.11
= control target key start
LH: loop header
LB: loop body
LE: loop exit
PB: predicated region body
PF: predicated region fallthrough
CT: control target
= control target key end

     0   :  { %s162_s0 = inlined_call_operand.vmem [shape: f32[16,32], index: 0, kind: input, shape index: {}]   ;;  %s163_s1 = inlined_call_operand.vmem [shape: f32[32,32], index: 1, kind: input, shape index: {}]   ;;  %s164_s2 = inlined_call_operand.vmem [shape: f32[1,32], index: 2, kind: input, shape index: {}]   ;;  %s165_s3 = inlined_call_operand.hbm [shape: f32[16,32], index: 3, kind: output, shape index: {}]  }
   0x1   :  { %v20_v0 = vld [vmem:[%s163_s1 + $0x18] sm:$0xff]  ;;  %v19_v1 = vld [vmem:[%s163_s1 + $0x10] sm:$0xff]  ;;  %v18_v2 = vld [vmem:[%s163_s1 + $0x8] sm:$0xff] }
   0x2   :  { %44 = vmatpush.msra.mxu0 %v20_v0  ;;  %77 = vmatpush.msra.mxu1 %v20_v0 }
   0x3   :  { %8 = vsyncpa [#allocation3], 0  ;;  %v17_v3 = vld [vmem:[%s163_s1] sm:$0xff]  ;;  %vm25_vm0 = vcmask 261120   ;;  %v16_v5 = vld [vmem:[%s162_s0 + $0x8] sm:$0xff]  ;;  %s111_s1 = smov [#allocation2]  }
   0x4   :  { %45 = vmatpush.msra.mxu0 %v19_v1  ;;  %78 = vmatpush.msra.mxu1 %v19_v1  ;;  %v15_v4 = vld [vmem:[%s162_s0] sm:$0xff]  ;;  %s61_s26 = sshll.u32 %s111_s1, 4  ;;  %s63_s29 = sshll.u32 %s165_s3, 4  ;;  %s62_s26 = int_to_ptr.vmem [resolvable:$true] %s61_s26  ;;  %s64_s29 = int_to_ptr.hbm [resolvable:$true] %s63_s29 }
   0x5   :  { %v84_v6 = vld [vmem:[%s164_s2] ss:$0 sm:$0xff]  ;;  %s112_s0 = smov 128   ;;  %s113_s30 = smov 8  }
   0x6   :  { %46 = vmatpush.msra.mxu0 %v18_v2  ;;  %79 = vmatpush.msra.mxu1 %v18_v2 }
   0x8   :  { %47 = vmatpush.msra.mxu0 %v17_v3  ;;  %80 = vmatpush.msra.mxu1 %v17_v3 }
   0x9   :  { %75 = vmatmul.msk.f32.vlgmr.msra.gmra.mxu0 %vm25_vm0, %v15_v4  ;;  %76 = vmatmul.msk.f32.vlgmr.msra.gmra.mxu1 %vm25_vm0, %v16_v5 }
  0x86   :  { %v49_v7 = vpop.f32.mrf.mxu0  ;;  %v52_v8 = vpop.f32.mrf.mxu1 }
  0x87   :  { %v50_v9 = vadd.f32 %v84_v6, %v49_v7  ;;  %v53_v10 = vadd.f32 %v84_v6, %v52_v8 }
  0x89   :  { %55 = vst.msk [vmem:[#allocation2] sm:$0xff] %vm25_vm0, %v50_v9 }
  0x8a   :  { %56 = vst.msk [vmem:[#allocation2 + $0x8] sm:$0xff] %vm25_vm0, %v53_v10 }
  0x8b   :  { %69 = dma.vmem_to_hbm [thread:$0]  %s62_s26, 256, %s64_s29, [#allocation3], %s112_s0, %s112_s0, %s113_s30  }
  0x8c   :  { %109 = dma.done.wait [#allocation3], 256  }
  0x8d   :  { %110 = vsyncadd [#allocation3], 4294967040 }
  0x8e   :  { %74 = vsyncpa [#allocation3], 1 }

// kernel: strided_local_relpos_mhsa.10
= control target key start
LH: loop header
LB: loop body
LE: loop exit
PB: predicated region body
PF: predicated region fallthrough
CT: control target
= control target key end

     0   :  { %10 = vsyncpa [#allocation3], 0  ;;  %s1567_s0 = inlined_call_operand.vmem [shape: f32[4,4,4,8], index: 0, kind: input, shape index: {}]   ;;  %s1568_s1 = inlined_call_operand.vmem [shape: f32[4,8,64], index: 1, kind: input, shape index: {}]   ;;  %s1569_s2 = inlined_call_operand.vmem [shape: f32[4,4,4,8], index: 2, kind: input, shape index: {}]   ;;  %s1570_s3 = inlined_call_operand.hbm [shape: f32[4,4,4,8], index: 3, kind: output, shape index: {0}]   ;;  %s1571_s4 = inlined_call_operand.vmem [shape: f32[4,4,32], index: 4, kind: output, shape index: {1}]  }
   0x1   :  { %12 = vsyncpa [#allocation3 + $0x1], 0  ;;  %s1330_s15 = smov 0   ;;  %s1332_s16 = smov 0  }
   0x2   :  { %s1334_s17 = smov 0   ;;  %s1336_s18 = smov 0  }
   0x3 LB: > { %s1351_s19 = sadd.s32 4294967295, %s1291_s18   ;;  %s1077_s20 = sadd.s32 4294967294, %s1291_s18   ;;  %s1291_s18 = sphi %s1336_s18, %s1577_s18   ;;  %s1287_s17 = sphi %s1334_s17, %s1576_s17   ;;  %s1283_s16 = sphi %s1332_s16, %s1575_s16   ;;  %s1279_s15 = sphi %s1330_s15, %s1574_s15  }
   0x4   : > { %s1355_s21 = sadd.s32 1, %s1291_s18   ;;  %s103_s22 = sadd.s32 1, %s1287_s17 }
   0x5   : > { %s100_s23 = ssub.s32 %s1291_s18, %s1355_s21  ;;  %p113_p0 = scmp.ne.s32.totalorder %s1287_s17, %s1283_s16 }
   0x6   : > { %p101_p1 = scmp.eq.s32.totalorder %s100_s23, 0  ;;  %p114_p2 = scmp.eq.s32.totalorder %s1351_s19, 1 }
   0x7   : > { %p119_p3 = scmp.ne.s32.totalorder %s1283_s16, %s1279_s15  ;;  %p120_p4 = scmp.eq.s32.totalorder %s1077_s20, 1 }
   0x8   : > { %s1366_s24 = scalar_select %p101_p1, %s1287_s17, %s103_s22  }
   0x9   : > { %p1368_p5 = por %p114_p2, %p113_p0  ;;  %p1372_p6 = por %p120_p4, %p119_p3 }
   0xa   : > { %p1080_p7 = scmp.ge.s32.totalorder %s1291_s18, 1  ;;  %p193_p8 = scmp.lt.s32.totalorder %s1291_s18, 3 }
   0xc   : > { %p194_p9 = pnand %p1080_p7, %p193_p8 }
   0xd   : > { %s1082_s27 = sshll.u32 (!%p194_p9), %s1351_s19, 1  ;;  %s1293_s13 = smov (!%p194_p9), 120  }
   0xe   : > { %197 = sbr.rel (%p194_p9) target bundleno = 1103 (0x44f), region = 32  ;;  %p237_p10 = scmp.lt.s32.totalorder (!%p194_p9), %s1082_s27, 3 }
   0xf   : > { %s1294_s14 = smov (!%p194_p9), 96   ;;  %s1295_s20 = smov (!%p194_p9), 112  }
  0x10   : > { %s1296_s22 = smov (!%p194_p9), 104   ;;  %s226_s23 = sand.u32 (!%p194_p9), 1, %s1283_s16  }
  0x11   : > { %s1297_s30 = smov (!%p194_p9), 88   ;;  %s1298_s5 = smov (!%p194_p9), 80  }
  0x12   : > { %s1300_s7 = smov (!%p194_p9), 8   ;;  %s1125_s8 = sshll.u32 (!%p194_p9), %s1351_s19, 5 }
  0x13   : > { %s1579_s27 = smov (!%p237_p10, %s1082_s27), 3  ;;  %vm281_vm0 = vcmask 64512   ;;  %vm334_vm1 = vcmask 60416   ;;  %s958_s11 = scalar_lea.hbm %s1570_s3, %s1125_s8 }
  0x14   : > { %s1086_s28 = sshll.u32 %s1579_s27, 3  ;;  %s1122_s29 = sshll.u32 %s1579_s27, 4 }
  0x15   : > { %s247_s6 = scalar_lea.vmem %s1568_s1, %s1086_s28  ;;  %s1389_s9 = scalar_lea.vmem %s1567_s0, %s1122_s29 }
  0x16   : > { %v271_v0 = vld [vmem:[%s247_s6] sm:$0xff]  ;;  %v272_v1 = vld [vmem:[%s247_s6 + $0x8] sm:$0xff]  ;;  %v267_v3 = vld [vmem:[%s1389_s9 + $0x10] sm:$0xf]  ;;  %s1400_s12 = scalar_lea.vmem %s1569_s2, %s1122_s29  ;;  %s1081_s28 = sshll.u32 %s226_s23, 5 }
  0x17   : > { %1092 = vmatpush.xpose.msk.msra.mxu0 %vm281_vm0, %v271_v0  ;;  %v263_v2 = vld [vmem:[%s1389_s9] sm:$0xf]  ;;  %1094 = vmatpush.xpose.msk.msra.mxu1 %vm281_vm0, %v272_v1  ;;  %v277_v7 = vld [vmem:[%s1400_s12 + $0x10] sm:$0xf]  ;;  %v1407_v20 = vpack.i.bf16 %v272_v1, %v271_v0  ;;  %s1417_s29 = scalar_lea.vmem [#allocation2], %s1081_s28  ;;  %s1299_s6 = smov 72  }
  0x18   : > { %v273_v4 = vld [vmem:[%s1400_s12] sm:$0xf]  ;;  %v264_v53 = vld [vmem:[%s1389_s9 + $0x4] sm:$0xf]  ;;  %v268_v56 = vld [vmem:[%s1389_s9 + $0x14] sm:$0xf] }
  0x19   : > { %1178 = vrot.lane.b32.xlu2 %v1407_v20, %s1294_s14  ;;  %v265_v57 = vld [vmem:[%s1389_s9 + $0x8] sm:$0xf]  ;;  %v269_v59 = vld [vmem:[%s1389_s9 + $0x18] sm:$0xf]  ;;  %v266_v60 = vld [vmem:[%s1389_s9 + $0xc] sm:$0xf] }
  0x1a   : > { %1093 = vmatmul.msk.f32.vlgmr.msra.gmra.mxu0 %vm281_vm0, %v263_v2  ;;  %1095 = vmatmul.msk.f32.vlgmr.msra.gmra.mxu1 %vm281_vm0, %v267_v3  ;;  %v270_v61 = vld [vmem:[%s1389_s9 + $0x1c] sm:$0xf]  ;;  %v274_v63 = vld [vmem:[%s1400_s12 + $0x4] sm:$0xf]  ;;  %s1301_s14 = smov 16  }
  0x21   : > { %435 = vrot.lane.b32.xlu2 %v271_v0, %s1293_s13 }
  0x29   : > { %616 = vrot.lane.b32.xlu2 %v272_v1, %s1295_s20 }
  0x31   : > { %743 = vrot.lane.b32.xlu2 %v271_v0, %s1296_s22 }
  0x39   : > { %770 = vrot.lane.b32.xlu2 %v272_v1, %s1296_s22 }
  0x73   : > { %v1179_v23 = vpop.permute.xlu2 %1178 }
  0x74   : > { %v1180_v24 = vunpack.i.l.bf16 %v1179_v23  ;;  %v1181_v25 = vunpack.i.h.bf16 %v1179_v23 }
  0x76   : > { %404 = vmatpush.msra.mxu2 %v1180_v24  ;;  %430 = vmatpush.msra.mxu3 %v1181_v25 }
  0x7b   : > { %v436_v26 = vpop.permute.xlu2 %435 }
  0x7c   : > { %1098 = vmatpush.xpose.msk.msrb.mxu2 %vm281_vm0, %v436_v26 }
  0x83   : > { %v617_v37 = vpop.permute.xlu2 %616 }
  0x8b   : > { %v744_v51 = vpop.permute.xlu2 %743 }
  0x93   : > { %v771_v58 = vpop.permute.xlu2 %770 }
  0x97   : > { %v305_v5 = vpop.f32.mrf.mxu0  ;;  %v331_v8 = vpop.f32.mrf.mxu1 }
  0x98   : > { %v306_v6 = vadd.f32 %v305_v5, %v273_v4  ;;  %v332_v10 = vadd.f32 %v331_v8, %v277_v7  ;;  %v278_v4 = vld [vmem:[%s1400_s12 + $0x14] sm:$0xf]  ;;  %v275_v5 = vld [vmem:[%s1400_s12 + $0x8] sm:$0xf] }
  0x9a   : > { %v335_v9 = vsel %vm334_vm1, %v306_v6, -inf  ;;  %v338_v11 = vsel %vm334_vm1, %v332_v10, -inf }
  0x9b   : > { %336 = vmax.xlane.f32.xlu0 %v335_v9 }
  0xa3   : > { %339 = vmax.xlane.f32.xlu0 %v338_v11 }
  0xb7   : > { %462 = vrot.lane.b32.xlu0 %v272_v1, %s1293_s13  ;;  %s961_s13 = sshll.u32 %s958_s11, 4  ;;  %s962_s13 = int_to_ptr.hbm [resolvable:$true] %s961_s13 }
  0xb8   : > { %s1243_s22 = sshra.s32 %s962_s13, 4  ;;  %s1244_s22 = int_to_ptr.hbm [resolvable:$true] %s1243_s22 }
  0xb9   : > { %s1245_s28 = scalar_lea.hbm %s1244_s22, 32  ;;  %p1250_p0 = scmp.lt.s32.totalorder %s1244_s22, %s1570_s3 }
  0xba   : > { %p1246_p11 = scmp.ne.s32.totalorder %s1244_s22, %s1245_s28 }
  0xbc   : > { %p1247_p12 = pnand %p1246_p11, %p1368_p5 }
  0xbe   : > { %p1248_p13 = pneg %p1247_p12 }
 0x10e   : > { %v337_v12 = vpop.xlane.xlu0 %336 }
 0x10f   : > { %v341_v13 = vsub.f32 %v306_v6, %v337_v12  ;;  %v279_v12 = vld [vmem:[%s1400_s12 + $0x18] sm:$0xf] }
 0x111   : > { %v343_v14 = vmul.f32 1.442695, %v341_v13  ;;  %v276_v13 = vld [vmem:[%s1400_s12 + $0xc] sm:$0xf] }
 0x113   : > { %1197 = vpow2.f32 %v343_v14 }
 0x116   : > { %v340_v15 = vpop.xlane.xlu0 %339 }
 0x117   : > { %v342_v16 = vsub.f32 %v332_v10, %v340_v15 }
 0x119   : > { %v1198_v17 = vpop.eup %1197  ;;  %v345_v18 = vmul.f32 1.442695, %v342_v16 }
 0x11a   : > { %v347_v19 = vsel %vm334_vm1, %v1198_v17, 0.0 }
 0x11b   : > { %1199 = vpow2.f32 %v345_v18  ;;  %348 = vadd.xlane.f32.xlu1 %v347_v19 }
 0x121   : > { %v1200_v21 = vpop.eup %1199 }
 0x122   : > { %v350_v22 = vsel %vm334_vm1, %v1200_v21, 0.0 }
 0x123   : > { %351 = vadd.xlane.f32.xlu1 %v350_v22 }
 0x129   : > { %v463_v28 = vpop.permute.xlu0 %462 }
 0x12a   : > { %1100 = vmatpush.xpose.msk.msrb.mxu3 %vm281_vm0, %v463_v28 }
 0x13c   : > { %589 = vrot.lane.b32.xlu1 %v271_v0, %s1295_s20  ;;  %s941_s20 = scalar_lea.sflag [#allocation3], %s226_s23 }
 0x18e   : > { %v349_v27 = vpop.xlane.xlu1 %348 }
 0x18f   : > { %1201 = vrcp.f32 %v349_v27  ;;  %v364_v33 = vand.u32 2147483648, %v349_v27  ;;  %v362_v35 = vand.u32 2147483647, %v349_v27  ;;  %vm358_vm3 = vweird.f32 %v349_v27 }
 0x191   : > { %v365_v39 = vor.u32 1.1754944e-38, %v364_v33  ;;  %vm363_vm5 = vcmp.eq.f32.partialorder %v362_v35, 8.507059e+37 }
 0x195   : > { %v1202_v29 = vpop.eup %1201 }
 0x196   : > { %v354_v30 = vmul.f32 %v1202_v29, %v349_v27  ;;  %v352_v31 = vpop.xlane.xlu1 %351  ;;  %vm359_vm2 = vweird.f32 %v1202_v29 }
 0x197   : > { %1203 = vrcp.f32 %v352_v31  ;;  %vm360_vm4 = vmor %vm358_vm3, %vm359_vm2  ;;  %v378_v45 = vand.u32 2147483648, %v352_v31  ;;  %v376_v47 = vand.u32 2147483647, %v352_v31  ;;  %vm372_vm7 = vweird.f32 %v352_v31 }
 0x198   : > { %v355_v32 = vsub.f32 1.0, %v354_v30 }
 0x199   : > { %v379_v49 = vor.u32 1.1754944e-38, %v378_v45  ;;  %vm377_vm9 = vcmp.eq.f32.partialorder %v376_v47, 8.507059e+37 }
 0x19a   : > { %v356_v34 = vmul.f32 %v1202_v29, %v355_v32 }
 0x19c   : > { %v357_v36 = vadd.f32 %v1202_v29, %v356_v34 }
 0x19d   : > { %v1204_v38 = vpop.eup %1203 }
 0x19e   : > { %v368_v40 = vmul.f32 %v1204_v38, %v352_v31  ;;  %v361_v41 = vsel %vm360_vm4, %v1202_v29, %v357_v36  ;;  %vm373_vm6 = vweird.f32 %v1204_v38 }
 0x19f   : > { %v366_v42 = vsel %vm363_vm5, %v365_v39, %v361_v41  ;;  %vm374_vm8 = vmor %vm372_vm7, %vm373_vm6 }
 0x1a0   : > { %v369_v43 = vsub.f32 1.0, %v368_v40  ;;  %v381_v44 = vmul.f32 %v1198_v17, %v366_v42 }
 0x1a2   : > { %v370_v46 = vmul.f32 %v1204_v38, %v369_v43  ;;  %1096 = vmatmul.msk.f32.vlgmr.msra.gmra.mxu2 %vm281_vm0, %v381_v44  ;;  %932 = vst.msk [vmem:[%s1417_s29] sm:$0xf] %vm334_vm1, %v381_v44 }
 0x1a4   : > { %v371_v48 = vadd.f32 %v1204_v38, %v370_v46 }
 0x1a6   : > { %v375_v50 = vsel %vm374_vm8, %v1204_v38, %v371_v48 }
 0x1a7   : > { %v380_v52 = vsel %vm377_vm9, %v379_v49, %v375_v50 }
 0x1a8   : > { %v382_v54 = vmul.f32 %v1200_v21, %v380_v52  ;;  %v280_v21 = vld [vmem:[%s1400_s12 + $0x1c] sm:$0xf]  ;;  %s959_s12 = sshll.u32 %s1417_s29, 4  ;;  %s960_s12 = int_to_ptr.vmem [resolvable:$true] %s959_s12 }
 0x1aa   : > { %1097 = vmatmul.msk.f32.vlgmr.msra.gmra.mxu3 %vm281_vm0, %v382_v54  ;;  %936 = vst.msk [vmem:[%s1417_s29 + $0x10] sm:$0xf] %vm334_vm1, %v382_v54  ;;  %1099 = vmatmul.msk.f32.vlgmr.msrb.gmra.mxu2 %vm281_vm0, %v264_v53 }
 0x1ab   : > { %1106 = vmatpush.xpose.msk.msra.mxu3 %vm281_vm0, %v617_v37 }
 0x1ae   : > { %v590_v55 = vpop.permute.xlu1 %589 }
 0x1af   : > { %1104 = vmatpush.xpose.msk.msra.mxu2 %vm281_vm0, %v590_v55 }
 0x1b2   : > { %1101 = vmatmul.msk.f32.vlgmr.msrb.gmra.mxu3 %vm281_vm0, %v268_v56  ;;  %1105 = vmatmul.msk.f32.vlgmr.msra.gmra.mxu2 %vm281_vm0, %v265_v57 }
 0x1b3   : > { %1110 = vmatpush.xpose.msk.msrb.mxu2 %vm281_vm0, %v744_v51  ;;  %1112 = vmatpush.xpose.msk.msrb.mxu3 %vm281_vm0, %v771_v58 }
 0x1ba   : > { %1107 = vmatmul.msk.f32.vlgmr.msra.gmra.mxu3 %vm281_vm0, %v269_v59  ;;  %1111 = vmatmul.msk.f32.vlgmr.msrb.gmra.mxu2 %vm281_vm0, %v266_v60 }
 0x1c2   : > { %1113 = vmatmul.msk.f32.vlgmr.msrb.gmra.mxu3 %vm281_vm0, %v270_v61 }
 0x225   : > { %v1440_v62 = vpop.f32.mrf.mxu2 }
 0x22d   : > { %v1443_v0 = vpop.f32.mrf.mxu3  ;;  %v459_v1 = vpop.f32.mrf.mxu2 }
 0x22e   : > { %v460_v2 = vadd.f32 %v459_v1, %v274_v63 }
 0x230   : > { %v489_v3 = vsel %vm334_vm1, %v460_v2, -inf }
 0x231   : > { %490 = vmax.xlane.f32.xlu0 %v489_v3 }
 0x235   : > { %v486_v6 = vpop.f32.mrf.mxu3  ;;  %v613_v7 = vpop.f32.mrf.mxu2 }
 0x236   : > { %v487_v8 = vadd.f32 %v486_v6, %v278_v4  ;;  %v614_v9 = vadd.f32 %v613_v7, %v275_v5 }
 0x238   : > { %v643_v10 = vsel %vm334_vm1, %v614_v9, -inf  ;;  %v492_v11 = vsel %vm334_vm1, %v487_v8, -inf }
 0x239   : > { %644 = vmax.xlane.f32.xlu1 %v643_v10  ;;  %493 = vmax.xlane.f32.xlu2 %v492_v11 }
 0x23d   : > { %v640_v14 = vpop.f32.mrf.mxu3  ;;  %v767_v15 = vpop.f32.mrf.mxu2 }
 0x23e   : > { %v641_v16 = vadd.f32 %v640_v14, %v279_v12  ;;  %v768_v17 = vadd.f32 %v767_v15, %v276_v13 }
 0x240   : > { %v646_v18 = vsel %vm334_vm1, %v641_v16, -inf  ;;  %v797_v19 = vsel %vm334_vm1, %v768_v17, -inf }
 0x241   : > { %647 = vmax.xlane.f32.xlu0 %v646_v18  ;;  %798 = vmax.xlane.f32.xlu2 %v797_v19 }
 0x245   : > { %v794_v22 = vpop.f32.mrf.mxu3 }
 0x246   : > { %v795_v23 = vadd.f32 %v794_v22, %v280_v21 }
 0x248   : > { %v800_v24 = vsel %vm334_vm1, %v795_v23, -inf }
 0x249   : > { %801 = vmax.xlane.f32.xlu1 %v800_v24 }
 0x2a4   : > { %v491_v25 = vpop.xlane.xlu0 %490 }
 0x2a5   : > { %v495_v26 = vsub.f32 %v460_v2, %v491_v25 }
 0x2a7   : > { %v497_v27 = vmul.f32 1.442695, %v495_v26 }
 0x2a9   : > { %1205 = vpow2.f32 %v497_v27 }
 0x2ac   : > { %v645_v28 = vpop.xlane.xlu1 %644  ;;  %v494_v29 = vpop.xlane.xlu2 %493 }
 0x2ad   : > { %v649_v30 = vsub.f32 %v614_v9, %v645_v28  ;;  %v496_v31 = vsub.f32 %v487_v8, %v494_v29 }
 0x2af   : > { %v1456_v32 = vpop.eup %1205  ;;  %v651_v33 = vmul.f32 1.442695, %v649_v30  ;;  %v499_v34 = vmul.f32 1.442695, %v496_v31 }
 0x2b0   : > { %v501_v35 = vsel %vm334_vm1, %v1456_v32, 0.0 }
 0x2b1   : > { %1207 = vpow2.f32 %v651_v33  ;;  %502 = vadd.xlane.f32.xlu0 %v501_v35 }
 0x2b2   : > { %1209 = vpow2.f32 %v499_v34 }
 0x2b4   : > { %v799_v36 = vpop.xlane.xlu2 %798  ;;  %v648_v37 = vpop.xlane.xlu0 %647 }
 0x2b5   : > { %v803_v38 = vsub.f32 %v768_v17, %v799_v36  ;;  %v650_v39 = vsub.f32 %v641_v16, %v648_v37 }
 0x2b7   : > { %v1460_v40 = vpop.eup %1207  ;;  %v805_v41 = vmul.f32 1.442695, %v803_v38  ;;  %v653_v42 = vmul.f32 1.442695, %v650_v39 }
 0x2b8   : > { %v1462_v43 = vpop.eup %1209  ;;  %v655_v44 = vsel %vm334_vm1, %v1460_v40, 0.0 }
 0x2b9   : > { %1211 = vpow2.f32 %v805_v41  ;;  %656 = vadd.xlane.f32.xlu1 %v655_v44  ;;  %v504_v45 = vsel %vm334_vm1, %v1462_v43, 0.0 }
 0x2ba   : > { %1213 = vpow2.f32 %v653_v42  ;;  %505 = vadd.xlane.f32.xlu2 %v504_v45 }
 0x2bc   : > { %v802_v46 = vpop.xlane.xlu1 %801 }
 0x2bd   : > { %v804_v47 = vsub.f32 %v795_v23, %v802_v46 }
 0x2bf   : > { %v1468_v48 = vpop.eup %1211  ;;  %v807_v49 = vmul.f32 1.442695, %v804_v47 }
 0x2c0   : > { %v1470_v50 = vpop.eup %1213  ;;  %v809_v51 = vsel %vm334_vm1, %v1468_v48, 0.0 }
 0x2c1   : > { %1215 = vpow2.f32 %v807_v49  ;;  %v658_v52 = vsel %vm334_vm1, %v1470_v50, 0.0 }
 0x2c2   : > { %810 = vadd.xlane.f32.xlu2 %v809_v51  ;;  %659 = vadd.xlane.f32.xlu0 %v658_v52 }
 0x2c7   : > { %v1476_v53 = vpop.eup %1215 }
 0x2c8   : > { %v812_v54 = vsel %vm334_vm1, %v1476_v53, 0.0 }
 0x2c9   : > { %813 = vadd.xlane.f32.xlu1 %v812_v54 }
 0x2d6   : > { %1183 = vrot.lane.b32.xlu0 %v1407_v20, %s1297_s30 }
 0x2da   : > { %1188 = vrot.lane.b32.xlu2 %v1407_v20, %s1298_s5 }
 0x2e2   : > { %1193 = vrot.lane.b32.xlu1 %v1407_v20, %s1299_s6 }
 0x324   : > { %v503_v55 = vpop.xlane.xlu0 %502 }
 0x325   : > { %1217 = vrcp.f32 %v503_v55  ;;  %v518_v63 = vand.u32 2147483648, %v503_v55  ;;  %v516_v1 = vand.u32 2147483647, %v503_v55  ;;  %vm512_vm11 = vweird.f32 %v503_v55 }
 0x327   : > { %v519_v5 = vor.u32 1.1754944e-38, %v518_v63  ;;  %vm517_vm13 = vcmp.eq.f32.partialorder %v516_v1, 8.507059e+37 }
 0x32b   : > { %v1218_v56 = vpop.eup %1217 }
 0x32c   : > { %v508_v57 = vmul.f32 %v1218_v56, %v503_v55  ;;  %v657_v58 = vpop.xlane.xlu1 %656  ;;  %vm513_vm10 = vweird.f32 %v1218_v56 }
 0x32d   : > { %1219 = vrcp.f32 %v657_v58  ;;  %v506_v59 = vpop.xlane.xlu2 %505  ;;  %vm514_vm12 = vmor %vm512_vm11, %vm513_vm10  ;;  %v672_v14 = vand.u32 2147483648, %v657_v58  ;;  %v670_v15 = vand.u32 2147483647, %v657_v58  ;;  %vm666_vm15 = vweird.f32 %v657_v58 }
 0x32e   : > { %v509_v60 = vsub.f32 1.0, %v508_v57  ;;  %1221 = vrcp.f32 %v506_v59  ;;  %v532_v19 = vand.u32 2147483648, %v506_v59  ;;  %v530_v22 = vand.u32 2147483647, %v506_v59 }
 0x32f   : > { %v673_v25 = vor.u32 1.1754944e-38, %v672_v14  ;;  %vm671_vm4 = vcmp.eq.f32.partialorder %v670_v15, 8.507059e+37  ;;  %vm526_vm5 = vweird.f32 %v506_v59 }
 0x330   : > { %v510_v61 = vmul.f32 %v1218_v56, %v509_v60  ;;  %v533_v30 = vor.u32 1.1754944e-38, %v532_v19  ;;  %vm531_vm7 = vcmp.eq.f32.partialorder %v530_v22, 8.507059e+37 }
 0x332   : > { %v511_v2 = vadd.f32 %v1218_v56, %v510_v61 }
 0x333   : > { %v1220_v3 = vpop.eup %1219 }
 0x334   : > { %v1222_v4 = vpop.eup %1221  ;;  %v662_v20 = vmul.f32 %v1220_v3, %v657_v58  ;;  %v515_v6 = vsel %vm514_vm12, %v1218_v56, %v511_v2  ;;  %vm667_vm14 = vweird.f32 %v1220_v3 }
 0x335   : > { %v522_v7 = vmul.f32 %v1222_v4, %v506_v59  ;;  %v811_v8 = vpop.xlane.xlu2 %810  ;;  %v1483_v9 = vpop.xlane.xlu0 %659  ;;  %v520_v11 = vsel %vm517_vm13, %v519_v5, %v515_v6  ;;  %vm668_vm2 = vmor %vm666_vm15, %vm667_vm14  ;;  %vm527_vm3 = vweird.f32 %v1222_v4 }
 0x336   : > { %v663_v10 = vsub.f32 1.0, %v662_v20  ;;  %1223 = vrcp.f32 %v811_v8  ;;  %v1487_v17 = vmul.f32 %v1456_v32, %v520_v11  ;;  %vm528_vm6 = vmor %vm526_vm5, %vm527_vm3  ;;  %v824_v33 = vand.u32 2147483647, %v811_v8 }
 0x337   : > { %v523_v12 = vsub.f32 1.0, %v522_v7  ;;  %1225 = vrcp.f32 %v1483_v9  ;;  %v826_v35 = vand.u32 2147483648, %v811_v8  ;;  %v686_v37 = vand.u32 2147483648, %v1483_v9 }
 0x338   : > { %v664_v13 = vmul.f32 %v1220_v3, %v663_v10  ;;  %933 = vst.msk [vmem:[%s1417_s29 + $0x4] sm:$0xf] %vm334_vm1, %v1487_v17  ;;  %v684_v45 = vand.u32 2147483647, %v1483_v9  ;;  %vm820_vm10 = vweird.f32 %v811_v8  ;;  %vm680_vm12 = vweird.f32 %v1483_v9 }
 0x339   : > { %v524_v16 = vmul.f32 %v1222_v4, %v523_v12  ;;  %v827_v49 = vor.u32 1.1754944e-38, %v826_v35  ;;  %vm825_vm13 = vcmp.eq.f32.partialorder %v824_v33, 8.507059e+37 }
 0x33a   : > { %v665_v18 = vadd.f32 %v1220_v3, %v664_v13  ;;  %vm685_vm15 = vcmp.eq.f32.partialorder %v684_v45, 8.507059e+37 }
 0x33b   : > { %v525_v21 = vadd.f32 %v1222_v4, %v524_v16 }
 0x33c   : > { %v1224_v23 = vpop.eup %1223  ;;  %v669_v24 = vsel %vm668_vm2, %v1220_v3, %v665_v18  ;;  %v1492_v26 = vpop.xlane.xlu1 %813 }
 0x33d   : > { %v1226_v27 = vpop.eup %1225  ;;  %v816_v28 = vmul.f32 %v1224_v23, %v811_v8  ;;  %1227 = vrcp.f32 %v1492_v26  ;;  %v674_v29 = vsel %vm671_vm4, %v673_v25, %v669_v24  ;;  %v529_v34 = vsel %vm528_vm6, %v1222_v4, %v525_v21  ;;  %v1189_v57 = vpop.permute.xlu2 %1188 }
 0x33e   : > { %v676_v31 = vmul.f32 %v1226_v27, %v1483_v9  ;;  %v534_v38 = vsel %vm531_vm7, %v533_v30, %v529_v34  ;;  %vm821_vm8 = vweird.f32 %v1224_v23  ;;  %v689_v42 = vmul.f32 %v1460_v40, %v674_v29 }
 0x33f   : > { %v817_v32 = vsub.f32 1.0, %v816_v28  ;;  %v536_v41 = vmul.f32 %v1462_v43, %v534_v38  ;;  %vm681_vm9 = vweird.f32 %v1226_v27  ;;  %vm822_vm11 = vmor %vm820_vm10, %vm821_vm8  ;;  %v687_v40 = vor.u32 1.1754944e-38, %v686_v37 }
 0x340   : > { %v677_v36 = vsub.f32 1.0, %v676_v31  ;;  %934 = vst.msk [vmem:[%s1417_s29 + $0x8] sm:$0xf] %vm334_vm1, %v689_v42  ;;  %vm682_vm14 = vmor %vm680_vm12, %vm681_vm9  ;;  %v840_v59 = vand.u32 2147483648, %v1492_v26  ;;  %v838_v63 = vand.u32 2147483647, %v1492_v26  ;;  %v1191_v5 = vunpack.i.h.bf16 %v1189_v57 }
 0x341   : > { %v818_v39 = vmul.f32 %v1224_v23, %v817_v32  ;;  %937 = vst.msk [vmem:[%s1417_s29 + $0x14] sm:$0xf] %vm334_vm1, %v536_v41  ;;  %v1190_v20 = vunpack.i.l.bf16 %v1189_v57  ;;  %vm834_vm3 = vweird.f32 %v1492_v26 }
 0x342   : > { %v678_v44 = vmul.f32 %v1226_v27, %v677_v36  ;;  %vm839_vm5 = vcmp.eq.f32.partialorder %v838_v63, 8.507059e+37 }
 0x343   : > { %v1228_v46 = vpop.eup %1227  ;;  %v819_v47 = vadd.f32 %v1224_v23, %v818_v39 }
 0x344   : > { %v679_v51 = vadd.f32 %v1226_v27, %v678_v44  ;;  %v830_v52 = vmul.f32 %v1228_v46, %v1492_v26  ;;  %vm835_vm2 = vweird.f32 %v1228_v46 }
 0x345   : > { %v823_v43 = vsel %vm822_vm11, %v1224_v23, %v819_v47  ;;  %vm836_vm4 = vmor %vm834_vm3, %vm835_vm2 }
 0x346   : > { %v828_v54 = vsel %vm825_vm13, %v827_v49, %v823_v43  ;;  %v683_v55 = vsel %vm682_vm14, %v1226_v27, %v679_v51  ;;  %v831_v56 = vsub.f32 1.0, %v830_v52 }
 0x347   : > { %v688_v58 = vsel %vm685_vm15, %v687_v40, %v683_v55  ;;  %v843_v60 = vmul.f32 %v1468_v48, %v828_v54  ;;  %v841_v48 = vor.u32 1.1754944e-38, %v840_v59 }
 0x348   : > { %v832_v61 = vmul.f32 %v1228_v46, %v831_v56  ;;  %v1184_v1 = vpop.permute.xlu0 %1183  ;;  %v690_v2 = vmul.f32 %v1470_v50, %v688_v58 }
 0x349   : > { %v1185_v3 = vunpack.i.l.bf16 %v1184_v1  ;;  %v1186_v4 = vunpack.i.h.bf16 %v1184_v1  ;;  %935 = vst.msk [vmem:[%s1417_s29 + $0xc] sm:$0xf] %vm334_vm1, %v843_v60 }
 0x34a   : > { %v833_v6 = vadd.f32 %v1228_v46, %v832_v61  ;;  %938 = vst.msk [vmem:[%s1417_s29 + $0x18] sm:$0xf] %vm334_vm1, %v690_v2 }
 0x34b   : > { %558 = vmatpush.msrb.mxu0 %v1185_v3  ;;  %584 = vmatpush.msrb.mxu1 %v1186_v4 }
 0x34c   : > { %v837_v7 = vsel %vm836_vm4, %v1228_v46, %v833_v6  ;;  %1102 = vmatmul.msk.f32.vlgmr.msrb.gmra.mxu0 %vm281_vm0, %v1487_v17  ;;  %1103 = vmatmul.msk.f32.vlgmr.msrb.gmra.mxu1 %vm281_vm0, %v536_v41 }
 0x34d   : > { %v842_v50 = vsel %vm839_vm5, %v841_v48, %v837_v7  ;;  %712 = vmatpush.msra.mxu0 %v1190_v20  ;;  %738 = vmatpush.msra.mxu1 %v1191_v5 }
 0x34e   : > { %v844_v8 = vmul.f32 %v1476_v53, %v842_v50 }
 0x350   : > { %939 = vst.msk [vmem:[%s1417_s29 + $0x1c] sm:$0xf] %vm334_vm1, %v844_v8  ;;  %s1249_s29 = scalar_lea.hbm %s1570_s3, 64 }
 0x351   : > { %p1251_p1 = scmp.lt.s32.totalorder %s1249_s29, %s1245_s28 }
 0x353   : > { %p1252_p2 = por %p1251_p1, %p1250_p0 }
 0x354   : > { %1108 = vmatmul.msk.f32.vlgmr.msra.gmra.mxu0 %vm281_vm0, %v689_v42  ;;  %1109 = vmatmul.msk.f32.vlgmr.msra.gmra.mxu1 %vm281_vm0, %v690_v2  ;;  %v1194_v9 = vpop.permute.xlu1 %1193 }
 0x355   : > { %v1196_v10 = vunpack.i.h.bf16 %v1194_v9  ;;  %v1195_v11 = vunpack.i.l.bf16 %v1194_v9  ;;  %p1253_p3 = pnand %p1252_p2, %p1248_p13 }
 0x357   : > { %866 = vmatpush.msrb.mxu0 %v1195_v11  ;;  %892 = vmatpush.msrb.mxu1 %v1196_v10 }
 0x35c   : > { %1114 = vmatmul.msk.f32.vlgmr.msrb.gmra.mxu0 %vm281_vm0, %v843_v60  ;;  %1115 = vmatmul.msk.f32.vlgmr.msrb.gmra.mxu1 %vm281_vm0, %v844_v8 }
 0x3c9   : > { %v560_v12 = vpop.f32.mrf.mxu0  ;;  %v586_v53 = vpop.f32.mrf.mxu1 }
 0x3ca   : > { %901 = vrot.lane.b32.xlu2 %v586_v53, %s1300_s7  ;;  %899 = vrot.lane.b32.xlu0 %v560_v12, %s1300_s7 }
 0x3d1   : > { %v714_v13 = vpop.f32.mrf.mxu0  ;;  %v740_v14 = vpop.f32.mrf.mxu1 }
 0x3d2   : > { %909 = vrot.lane.b32.xlu1 %v740_v14, %s1301_s14  ;;  %907 = vrot.lane.b32.xlu0 %v714_v13, %s1301_s14 }
 0x3d3   : > { %1256 = shalt.err (!%p1253_p3)
}
 0x3d4   : > { %s1302_s23 = smov 64   ;;  %s1303_s7 = smov 4   ;;  %vm923_vm1 = vcmask 130048   ;;  %vm926_vm6 = vcmask 195584   ;;  %vm929_vm7 = vcmask 257024  }
 0x3d5   : > { %1126 = dma.vmem_to_hbm [thread:$0]  (%p1368_p5), %s960_s12, 512, %s962_s13, %s941_s20, %s1302_s23, %s1302_s23, %s1303_s7  }
 0x3d6   : > { %s1304_s8 = smov 24   ;;  %s1091_s9 = sshll.u32 %s1579_s27, 2 }
 0x3d7   : > { %s261_s14 = scalar_lea.vmem %s1571_s4, %s1091_s9 }
 0x3d9   : > { %v868_v15 = vpop.f32.mrf.mxu0  ;;  %v894_v16 = vpop.f32.mrf.mxu1 }
 0x3da   : > { %917 = vrot.lane.b32.xlu0 %v894_v16, %s1304_s8  ;;  %915 = vrot.lane.b32.xlu2 %v868_v15, %s1304_s8 }
 0x424   : > { %v902_v18 = vpop.permute.xlu2 %901 }
 0x425   : > { %v922_v26 = vsel %vm281_vm0, %v1443_v0, %v902_v18 }
 0x434   : > { %v916_v22 = vpop.permute.xlu2 %915 }
 0x43c   : > { %v900_v17 = vpop.permute.xlu0 %899 }
 0x43d   : > { %v921_v19 = vsel %vm281_vm0, %v1440_v62, %v900_v17 }
 0x444   : > { %v908_v21 = vpop.permute.xlu0 %907  ;;  %v910_v25 = vpop.permute.xlu1 %909 }
 0x445   : > { %v924_v23 = vsel %vm923_vm1, %v921_v19, %v908_v21  ;;  %v925_v27 = vsel %vm923_vm1, %v922_v26, %v910_v25 }
 0x446   : > { %v927_v24 = vsel %vm926_vm6, %v924_v23, %v916_v22 }
 0x447   : > { %930 = vst.msk [vmem:[%s261_s14] sm:$0xf] %vm929_vm7, %v927_v24 }
 0x44c   : > { %v918_v28 = vpop.permute.xlu0 %917 }
 0x44d   : > { %v928_v29 = vsel %vm926_vm6, %v925_v27, %v918_v28 }
 0x44e   : > { %931 = vst.msk [vmem:[%s261_s14 + $0x4] sm:$0xf] %vm929_vm7, %v928_v29 }
 0x44f PF: > { %p1132_p4 = scmp.ge.s32.totalorder %s1291_s18, 2  ;;  %s980_s25 = sand.u32 1, %s1279_s15  }
 0x450   : > { %s981_s27 = scalar_lea.sflag [#allocation3], %s980_s25 }
 0x451   : > { %p1129_p5 = pnand %p1132_p4, %p1372_p6 }
 0x453   : > { %p1130_p7 = pneg %p1129_p5 }
 0x455   : > { %1274 = dma.done.wait (%p1130_p7), %s981_s27, 512  }
 0x456   : > { %1276 = vsyncadd (%p1130_p7), %s981_s27, 4294966784  ;;  %p15_p8 = scmp.ge.s32.totalorder %s1355_s21, 4   ;;  %s1574_s15 = smov %s1283_s16 }
 0x457   : > { %s1575_s16 = smov %s1287_s17  ;;  %s1576_s17 = smov %s1366_s24 }
 0x458   : > { %s1577_s18 = smov %s1355_s21  ;;  %17 = sbr.rel (!%p15_p8) target bundleno = 3 (0x3), region = 85 }
 0x45d   :  { %995 = vsyncpa [#allocation3], 1 }
 0x45e   :  { %997 = vsyncpa [#allocation3 + $0x1], 1 }

</bundles_post_ra>
